<compile_context>
chip_gen: v6e
topology: v6e:2x2x1
jax: 0.10.0
libtpu: 0.0.40
codegen_flags: <defaults>
</compile_context>

<pallas_src>
import jax
import jax.numpy as jnp
import numpy as np
from jax import lax
from jax.experimental import pallas as pl
from jax.experimental.pallas import tpu as pltpu


def _round_up(x, m):
    return ((x + m - 1) // m) * m


def _ceil_div(a, b):
    return -(-a // b)


# ---------------------------------------------------------------------------
# Kernel
# ---------------------------------------------------------------------------
def _make_rnn_kernel(num_layers, t_chunk, seq_valid, needs_mask):
    """Grid = (batch_chunks [parallel], time_chunks [arbitrary / sequential])."""

    n_w = 1 + 3 * (num_layers - 1)  # layer 0: w_hh only; layers > 0: (w_ih, w_hh, b)

    def kernel(x0_ref, h0_ref, *args):
        w_refs = args[:n_w]
        top_out_ref = args[n_w]
        h_out_ref = args[n_w + 1]
        if num_layers > 1:
            xproj_ref = args[n_w + 2]
            lay_out_ref = args[n_w + 3]

        ti = pl.program_id(1)  # time-chunk index (sequential recurrence axis)

        # h_n lives directly in its (revisited) output block; init once per batch chunk.
        @pl.when(ti == 0)
        def _():
            h_out_ref[...] = h0_ref[...]

        unroll = True if t_chunk <= 16 else 8

        for l in range(num_layers):
            last = (l == num_layers - 1)

            if l == 0:
                # layer-0 input projection + bias already folded into the gather table
                w_hh = w_refs[0][...]                                    # (H, H) bf16
            else:
                base = 1 + 3 * (l - 1)
                w_ih_ref, w_hh_ref, b_ref = w_refs[base], w_refs[base + 1], w_refs[base + 2]
                tc, bt, hp = xproj_ref.shape
                w_ih = w_ih_ref[...]                                     # (H, H) bf16
                bias = b_ref[...]                                        # (1, H) f32
                # Batched input projection over the whole chunk in MXU-filling
                # (~256-row) sub-blocks; bias folded in here, off the serial path.
                sub = max(1, min(tc, 256 // bt))
                start = 0
                while start < tc:
                    cur = min(sub, tc - start)
                    x_in = lay_out_ref[start:start + cur].reshape(cur * bt, hp)
                    p = jnp.dot(x_in.astype(jnp.bfloat16), w_ih,
                                preferred_element_type=jnp.float32)
                    xproj_ref[start:start + cur] = (p + bias).reshape(cur, bt, hp)
                    start += cur
                w_hh = w_hh_ref[...]                                     # (H, H) bf16

            h_init = h_out_ref[l]                                        # (B_TILE, H) f32

            def step(i, h):
                if l == 0:
                    xp = x0_ref[i].astype(jnp.float32)   # pre-projected emb (+bias)
                else:
                    xp = xproj_ref[i]                    # precomputed x @ W_ih + b
                # Recurrent product: bf16 MXU operands, f32 accumulation.
                acc = xp + jnp.dot(h.astype(jnp.bfloat16), w_hh,
                                   preferred_element_type=jnp.float32)
                h_new = jnp.tanh(acc)
                if needs_mask:
                    valid = (ti * t_chunk + i) < seq_valid
                    h_new = jnp.where(valid, h_new, h)   # padded steps don't advance h
                if last:
                    top_out_ref[i] = h_new.astype(top_out_ref.dtype)     # bf16 writeback
                else:
                    lay_out_ref[i] = h_new               # f32 in VMEM; cast at MXU site
                return h_new

            h_fin = lax.fori_loop(0, t_chunk, step, h_init, unroll=unroll)
            h_out_ref[l] = h_fin                         # write back once per chunk

    return kernel


# ---------------------------------------------------------------------------
# Wrapper: folded embedding gather, padding, pallas_call, FC projection, un-padding
# ---------------------------------------------------------------------------
@jax.jit
def rnn_language_model_forward(x_tokens, hidden, params):
    """Matches RNNLanguageModel.forward:
       returns (logits (batch*seq, vocab), h_n (num_layers, batch, hidden))."""
    emb_table = params["embedding"]        # (vocab, emb)
    layers = params["layers"]              # list of (w_ih, w_hh, b) with b = b_ih + b_hh
    fc_w, fc_b = params["fc_w"], params["fc_b"]

    num_layers = len(layers)
    batch, seq = x_tokens.shape
    hidden_dim = layers[0][1].shape[0]

    # ---- padded tile-friendly dims: batch -> x8 (sublanes), hidden -> x128 (lanes)
    B_pad = _round_up(batch, 8)
    H_pad = _round_up(hidden_dim, 128)

    # Batch tiling: single chunk when small; split into 2 chunks (>=16 rows each, bf16
    # sublane friendly) when possible so v7x's second TensorCore gets work; cap at 256
    # rows so v6e's 256-row MXU is filled without oversizing VMEM blocks.
    if B_pad % 32 == 0 and B_pad // 2 <= 256:
        B_TILE = B_pad // 2
    elif B_pad > 256 and B_pad % 256 == 0:
        B_TILE = 256
    else:
        B_TILE = B_pad
    n_b = B_pad // B_TILE

    # Divisor-free time chunking (target ~64 steps per chunk, minimal padding).
    n_t = max(1, _ceil_div(seq, 64))
    t_chunk = _ceil_div(seq, n_t)
    seq_pad = n_t * t_chunk
    needs_mask = seq_pad != seq

    # ---- fold layer-0 input projection + bias into the gather table (vocab, H_pad)
    w_ih0, w_hh0, b0 = layers[0]
    proj_table = jnp.pad(emb_table @ w_ih0 + b0,
                         ((0, 0), (0, H_pad - hidden_dim))).astype(jnp.bfloat16)

    # time-major token ids, padded (padded rows/steps compute values that are masked
    # or sliced off; zero lane padding is inert through the recurrence)
    x_t = jnp.pad(x_tokens.T, ((0, seq_pad - seq), (0, B_pad - batch)))   # (seq_pad, B_pad)
    x0_proj = proj_table[x_t]                                             # (seq_pad, B_pad, H_pad) bf16

    h0_p = jnp.pad(hidden, ((0, 0), (0, B_pad - batch), (0, H_pad - hidden_dim)))

    # ---- weights: layer 0 -> w_hh only; layers > 0 -> (w_ih, w_hh, b)
    hpad2 = ((0, H_pad - hidden_dim), (0, H_pad - hidden_dim))
    flat_weights = [jnp.pad(w_hh0, hpad2).astype(jnp.bfloat16)]
    w_specs = [pl.BlockSpec((H_pad, H_pad), lambda bi, ti: (0, 0))]
    for (w_ih, w_hh, b) in layers[1:]:
        flat_weights += [
            jnp.pad(w_ih, hpad2).astype(jnp.bfloat16),
            jnp.pad(w_hh, hpad2).astype(jnp.bfloat16),
            jnp.pad(b, ((0, 0), (0, H_pad - hidden_dim))),                # f32 bias
        ]
        w_specs += [
            pl.BlockSpec((H_pad, H_pad), lambda bi, ti: (0, 0)),
            pl.BlockSpec((H_pad, H_pad), lambda bi, ti: (0, 0)),
            pl.BlockSpec((1, H_pad), lambda bi, ti: (0, 0)),
        ]

    in_specs = [
        pl.BlockSpec((t_chunk, B_TILE, H_pad), lambda bi, ti: (ti, bi, 0)),    # x0 proj chunk
        pl.BlockSpec((num_layers, B_TILE, H_pad), lambda bi, ti: (0, bi, 0)),  # h0 chunk
    ] + w_specs

    out_specs = [
        # lane-dense top-layer hidden states (bf16 -> half the HBM writeback)
        pl.BlockSpec((t_chunk, B_TILE, H_pad), lambda bi, ti: (ti, bi, 0)),
        # resident h_n accumulator (revisited across the time axis)
        pl.BlockSpec((num_layers, B_TILE, H_pad), lambda bi, ti: (0, bi, 0)),
    ]
    out_shape = [
        jax.ShapeDtypeStruct((seq_pad, B_pad, H_pad), jnp.bfloat16),
        jax.ShapeDtypeStruct((num_layers, B_pad, H_pad), jnp.float32),
    ]

    scratch_shapes = []
    if num_layers > 1:
        scratch_shapes = [
            pltpu.VMEM((t_chunk, B_TILE, H_pad), jnp.float32),  # batched input projection
            pltpu.VMEM((t_chunk, B_TILE, H_pad), jnp.float32),  # previous-layer chunk outputs
        ]

    grid_spec = pltpu.PrefetchScalarGridSpec(
        num_scalar_prefetch=0,
        grid=(n_b, n_t),
        in_specs=in_specs,
        out_specs=out_specs,
        scratch_shapes=scratch_shapes,
    )

    top_h, h_n_p = pl.pallas_call(
        _make_rnn_kernel(num_layers, t_chunk, seq, needs_mask),
        out_shape=out_shape,
        grid_spec=grid_spec,
        input_output_aliases={1: 1},   # h0 is updated in place as h_n
        compiler_params=pltpu.CompilerParams(
            # batch chunks are independent; the time recurrence is strictly sequential
            dimension_semantics=("parallel", "arbitrary"),
        ),
    )(x0_proj, h0_p, *flat_weights)

    # ---- un-pad, convert to PyTorch layout, vocab projection outside the kernel
    top_h = top_h[:seq, :batch, :hidden_dim]                               # (seq, batch, H) bf16
    top_h = jnp.transpose(top_h, (1, 0, 2)).reshape(batch * seq, hidden_dim)
    logits = jnp.dot(top_h, fc_w.astype(jnp.bfloat16),
                     preferred_element_type=jnp.float32) + fc_b            # (batch*seq, vocab) f32
    h_n = h_n_p[:, :batch, :hidden_dim]                                    # (layers, batch, H) f32
    return logits, h_n


# ---------------------------------------------------------------------------
# Deterministic parameter init + pure-JAX (f32) reference of the PyTorch module
# ---------------------------------------------------------------------------
def init_params(key, vocab_size, embedding_dim, hidden_dim, num_layers):
    keys = jax.random.split(key, 3 + 4 * num_layers)
    scale = 1.0 / np.sqrt(hidden_dim)
    params = {}
    params["embedding"] = jax.random.normal(keys[0], (vocab_size, embedding_dim), jnp.float32)
    layers = []
    kidx = 1
    in_dim = embedding_dim
    for _ in range(num_layers):
        w_ih = jax.random.uniform(keys[kidx], (in_dim, hidden_dim), jnp.float32, -scale, scale)
        w_hh = jax.random.uniform(keys[kidx + 1], (hidden_dim, hidden_dim), jnp.float32, -scale, scale)
        b_ih = jax.random.uniform(keys[kidx + 2], (1, hidden_dim), jnp.float32, -scale, scale)
        b_hh = jax.random.uniform(keys[kidx + 3], (1, hidden_dim), jnp.float32, -scale, scale)
        layers.append((w_ih, w_hh, b_ih + b_hh))  # combined bias == PyTorch b_ih + b_hh
        kidx += 4
        in_dim = hidden_dim
    params["layers"] = layers
    params["fc_w"] = jax.random.uniform(keys[-2], (hidden_dim, vocab_size), jnp.float32, -scale, scale)
    params["fc_b"] = jax.random.uniform(keys[-1], (1, vocab_size), jnp.float32, -scale, scale)
    return params


def reference_forward(x_tokens, hidden, params):
    """Pure-JAX f32 replica of nn.Embedding -> nn.RNN(tanh, batch_first) -> nn.Linear."""
    emb = params["embedding"][x_tokens]  # (B, S, E)
    B, S, _ = emb.shape
    layer_in = emb
    h_last = []
    for l, (w_ih, w_hh, b) in enumerate(params["layers"]):
        h_l = hidden[l]
        outs = []
        for t in range(S):
            h_l = jnp.tanh(layer_in[:, t] @ w_ih + h_l @ w_hh + b)
            outs.append(h_l)
        layer_in = jnp.stack(outs, axis=1)  # (B, S, H)
        h_last.append(h_l)
    out = layer_in.reshape(-1, layer_in.shape[-1]) @ params["fc_w"] + params["fc_b"]
    return out, jnp.stack(h_last, axis=0)


# ---------------------------------------------------------------------------
if __name__ == "__main__":
    vocab_size, embedding_dim, hidden_dim, num_layers = 50, 32, 32, 2
    batch, seq = 2, 8

    key = jax.random.PRNGKey(0)
    pkey, xkey = jax.random.split(key)
    params = init_params(pkey, vocab_size, embedding_dim, hidden_dim, num_layers)

    x = jax.random.randint(xkey, (batch, seq), 0, vocab_size, dtype=jnp.int32)
    hidden0 = jnp.zeros((num_layers, batch, hidden_dim), jnp.float32)  # init_hidden()

    logits, h_n = rnn_language_model_forward(x, hidden0, params)
    logits = jax.block_until_ready(logits)
    h_n = jax.block_until_ready(h_n)

    assert logits.shape == (batch * seq, vocab_size)
    assert h_n.shape == (num_layers, batch, hidden_dim)

    ref_logits, ref_h_n = reference_forward(x, hidden0, params)
    # Tolerances account for bf16 MXU operands inside the kernel and the bf16 top_h /
    # FC path (accumulation, tanh and the resident hidden state remain f32).
    np.testing.assert_allclose(np.asarray(h_n), np.asarray(ref_h_n), rtol=1e-1, atol=1e-1)
    np.testing.assert_allclose(np.asarray(logits), np.asarray(ref_logits), rtol=1e-1, atol=1e-1)

    print("KERNEL_OK")
</pallas_src>

<mosaic_0001>
module attributes {stable_mosaic.version = 11 : i64} {
  func.func @kernel(%arg0: i32, %arg1: i32, %arg2: memref<8x8x128xbf16, #tpu.memory_space<vmem>>, %arg3: memref<2x8x128xf32, #tpu.memory_space<vmem>>, %arg4: memref<128x128xbf16, #tpu.memory_space<vmem>>, %arg5: memref<128x128xbf16, #tpu.memory_space<vmem>>, %arg6: memref<128x128xbf16, #tpu.memory_space<vmem>>, %arg7: memref<1x128xf32, #tpu.memory_space<vmem>>, %arg8: memref<8x8x128xbf16, #tpu.memory_space<vmem>>, %arg9: memref<2x8x128xf32, #tpu.memory_space<vmem>>, %arg10: memref<8x8x128xf32, #tpu.memory_space<vmem>>, %arg11: memref<8x8x128xf32, #tpu.memory_space<vmem>>) attributes {dimension_semantics = [#tpu.dimension_semantics<parallel>, #tpu.dimension_semantics<arbitrary>], iteration_bounds = array<i64: 1, 1>, scalar_prefetch = 0 : i64, scratch_operands = 2 : i64, tpu.core_type = #tpu.core_type<tc>, window_params = [{transform_indices = @transform_0, window_bounds = array<i64: 8, 8, 128>}, {transform_indices = @transform_1, window_bounds = array<i64: 2, 8, 128>}, {pipeline_mode = #tpu.pipeline_mode<synchronous>, transform_indices = @transform_2, window_bounds = array<i64: 128, 128>}, {pipeline_mode = #tpu.pipeline_mode<synchronous>, transform_indices = @transform_3, window_bounds = array<i64: 128, 128>}, {pipeline_mode = #tpu.pipeline_mode<synchronous>, transform_indices = @transform_4, window_bounds = array<i64: 128, 128>}, {pipeline_mode = #tpu.pipeline_mode<synchronous>, transform_indices = @transform_5, window_bounds = array<i64: 1, 128>}, {transform_indices = @transform_6, window_bounds = array<i64: 8, 8, 128>}, {transform_indices = @transform_7, window_bounds = array<i64: 2, 8, 128>}]} {
    %c0_i32 = arith.constant 0 : i32
    %0 = arith.cmpi eq, %arg1, %c0_i32 : i32
    %1 = arith.extui %0 : i1 to i32
    %c0_i32_0 = arith.constant 0 : i32
    %2 = arith.cmpi ne, %1, %c0_i32_0 : i32
    scf.if %2 {
      %c0_115 = arith.constant 0 : index
      %c0_116 = arith.constant 0 : index
      %c0_117 = arith.constant 0 : index
      %217 = vector.load %arg3[%c0_115, %c0_116, %c0_117] : memref<2x8x128xf32, #tpu.memory_space<vmem>>, vector<2x8x128xf32>
      %c0_118 = arith.constant 0 : index
      %c0_119 = arith.constant 0 : index
      %c0_120 = arith.constant 0 : index
      %218 = vector.load %arg9[%c0_118, %c0_119, %c0_120] : memref<2x8x128xf32, #tpu.memory_space<vmem>>, vector<2x8x128xf32>
      tpu.vector_store %arg9[%c0_118, %c0_119, %c0_120], %217 {strides = array<i32>} : memref<2x8x128xf32, #tpu.memory_space<vmem>>, vector<2x8x128xf32>,
    } else {
    }
    %c0 = arith.constant 0 : index
    %c0_1 = arith.constant 0 : index
    %3 = vector.load %arg4[%c0, %c0_1] : memref<128x128xbf16, #tpu.memory_space<vmem>>, vector<128x128xbf16>
    %c0_2 = arith.constant 0 : index
    %c0_3 = arith.constant 0 : index
    %c0_4 = arith.constant 0 : index
    %4 = vector.load %arg9[%c0_2, %c0_3, %c0_4] : memref<2x8x128xf32, #tpu.memory_space<vmem>>, vector<1x8x128xf32>
    %5 = vector.shape_cast %4 : vector<1x8x128xf32> to vector<8x128xf32>
    %c0_i32_5 = arith.constant 0 : i32
    %6 = arith.index_cast %c0_i32_5 : i32 to index
    %c0_6 = arith.constant 0 : index
    %c0_7 = arith.constant 0 : index
    %7 = vector.load %arg2[%6, %c0_6, %c0_7] : memref<8x8x128xbf16, #tpu.memory_space<vmem>>, vector<1x8x128xbf16>
    %8 = vector.shape_cast %7 : vector<1x8x128xbf16> to vector<8x128xbf16>
    %9 = arith.extf %8 : vector<8x128xbf16> to vector<8x128xf32>
    %10 = arith.truncf %5 : vector<8x128xf32> to vector<8x128xbf16>
    %cst = arith.constant dense<0.000000e+00> : vector<8x128xf32>
    %11 = tpu.matmul %10, %3, %cst {dimension_numbers = #tpu.dot_dimension_numbers<[1], [0], [0], [1], [0, 0, 1, 1], [], []>} : vector<8x128xbf16>, vector<128x128xbf16>, vector<8x128xf32> -> vector<8x128xf32>
    %12 = arith.addf %9, %11 : vector<8x128xf32>
    %13 = math.tanh %12 : vector<8x128xf32>
    %14 = arith.index_cast %c0_i32_5 : i32 to index
    %c0_8 = arith.constant 0 : index
    %c0_9 = arith.constant 0 : index
    %15 = vector.load %arg11[%14, %c0_8, %c0_9] : memref<8x8x128xf32, #tpu.memory_space<vmem>>, vector<1x8x128xf32>
    %16 = vector.shape_cast %15 : vector<1x8x128xf32> to vector<8x128xf32>
    %17 = vector.shape_cast %13 : vector<8x128xf32> to vector<1x8x128xf32>
    tpu.vector_store %arg11[%14, %c0_8, %c0_9], %17 {strides = array<i32>} : memref<8x8x128xf32, #tpu.memory_space<vmem>>, vector<1x8x128xf32>,
    %c1_i32 = arith.constant 1 : i32
    %18 = arith.index_cast %c1_i32 : i32 to index
    %c0_10 = arith.constant 0 : index
    %c0_11 = arith.constant 0 : index
    %19 = vector.load %arg2[%18, %c0_10, %c0_11] : memref<8x8x128xbf16, #tpu.memory_space<vmem>>, vector<1x8x128xbf16>
    %20 = vector.shape_cast %19 : vector<1x8x128xbf16> to vector<8x128xbf16>
    %21 = arith.extf %20 : vector<8x128xbf16> to vector<8x128xf32>
    %22 = arith.truncf %13 : vector<8x128xf32> to vector<8x128xbf16>
    %cst_12 = arith.constant dense<0.000000e+00> : vector<8x128xf32>
    %23 = tpu.matmul %22, %3, %cst_12 {dimension_numbers = #tpu.dot_dimension_numbers<[1], [0], [0], [1], [0, 0, 1, 1], [], []>} : vector<8x128xbf16>, vector<128x128xbf16>, vector<8x128xf32> -> vector<8x128xf32>
    %24 = arith.addf %21, %23 : vector<8x128xf32>
    %25 = math.tanh %24 : vector<8x128xf32>
    %26 = arith.index_cast %c1_i32 : i32 to index
    %c0_13 = arith.constant 0 : index
    %c0_14 = arith.constant 0 : index
    %27 = vector.load %arg11[%26, %c0_13, %c0_14] : memref<8x8x128xf32, #tpu.memory_space<vmem>>, vector<1x8x128xf32>
    %28 = vector.shape_cast %27 : vector<1x8x128xf32> to vector<8x128xf32>
    %29 = vector.shape_cast %25 : vector<8x128xf32> to vector<1x8x128xf32>
    tpu.vector_store %arg11[%26, %c0_13, %c0_14], %29 {strides = array<i32>} : memref<8x8x128xf32, #tpu.memory_space<vmem>>, vector<1x8x128xf32>,
    %c2_i32 = arith.constant 2 : i32
    %30 = arith.index_cast %c2_i32 : i32 to index
    %c0_15 = arith.constant 0 : index
    %c0_16 = arith.constant 0 : index
    %31 = vector.load %arg2[%30, %c0_15, %c0_16] : memref<8x8x128xbf16, #tpu.memory_space<vmem>>, vector<1x8x128xbf16>
    %32 = vector.shape_cast %31 : vector<1x8x128xbf16> to vector<8x128xbf16>
    %33 = arith.extf %32 : vector<8x128xbf16> to vector<8x128xf32>
    %34 = arith.truncf %25 : vector<8x128xf32> to vector<8x128xbf16>
    %cst_17 = arith.constant dense<0.000000e+00> : vector<8x128xf32>
    %35 = tpu.matmul %34, %3, %cst_17 {dimension_numbers = #tpu.dot_dimension_numbers<[1], [0], [0], [1], [0, 0, 1, 1], [], []>} : vector<8x128xbf16>, vector<128x128xbf16>, vector<8x128xf32> -> vector<8x128xf32>
    %36 = arith.addf %33, %35 : vector<8x128xf32>
    %37 = math.tanh %36 : vector<8x128xf32>
    %38 = arith.index_cast %c2_i32 : i32 to index
    %c0_18 = arith.constant 0 : index
    %c0_19 = arith.constant 0 : index
    %39 = vector.load %arg11[%38, %c0_18, %c0_19] : memref<8x8x128xf32, #tpu.memory_space<vmem>>, vector<1x8x128xf32>
    %40 = vector.shape_cast %39 : vector<1x8x128xf32> to vector<8x128xf32>
    %41 = vector.shape_cast %37 : vector<8x128xf32> to vector<1x8x128xf32>
    tpu.vector_store %arg11[%38, %c0_18, %c0_19], %41 {strides = array<i32>} : memref<8x8x128xf32, #tpu.memory_space<vmem>>, vector<1x8x128xf32>,
    %c3_i32 = arith.constant 3 : i32
    %42 = arith.index_cast %c3_i32 : i32 to index
    %c0_20 = arith.constant 0 : index
    %c0_21 = arith.constant 0 : index
    %43 = vector.load %arg2[%42, %c0_20, %c0_21] : memref<8x8x128xbf16, #tpu.memory_space<vmem>>, vector<1x8x128xbf16>
    %44 = vector.shape_cast %43 : vector<1x8x128xbf16> to vector<8x128xbf16>
    %45 = arith.extf %44 : vector<8x128xbf16> to vector<8x128xf32>
    %46 = arith.truncf %37 : vector<8x128xf32> to vector<8x128xbf16>
    %cst_22 = arith.constant dense<0.000000e+00> : vector<8x128xf32>
    %47 = tpu.matmul %46, %3, %cst_22 {dimension_numbers = #tpu.dot_dimension_numbers<[1], [0], [0], [1], [0, 0, 1, 1], [], []>} : vector<8x128xbf16>, vector<128x128xbf16>, vector<8x128xf32> -> vector<8x128xf32>
    %48 = arith.addf %45, %47 : vector<8x128xf32>
    %49 = math.tanh %48 : vector<8x128xf32>
    %50 = arith.index_cast %c3_i32 : i32 to index
    %c0_23 = arith.constant 0 : index
    %c0_24 = arith.constant 0 : index
    %51 = vector.load %arg11[%50, %c0_23, %c0_24] : memref<8x8x128xf32, #tpu.memory_space<vmem>>, vector<1x8x128xf32>
    %52 = vector.shape_cast %51 : vector<1x8x128xf32> to vector<8x128xf32>
    %53 = vector.shape_cast %49 : vector<8x128xf32> to vector<1x8x128xf32>
    tpu.vector_store %arg11[%50, %c0_23, %c0_24], %53 {strides = array<i32>} : memref<8x8x128xf32, #tpu.memory_space<vmem>>, vector<1x8x128xf32>,
    %c4_i32 = arith.constant 4 : i32
    %54 = arith.index_cast %c4_i32 : i32 to index
    %c0_25 = arith.constant 0 : index
    %c0_26 = arith.constant 0 : index
    %55 = vector.load %arg2[%54, %c0_25, %c0_26] : memref<8x8x128xbf16, #tpu.memory_space<vmem>>, vector<1x8x128xbf16>
    %56 = vector.shape_cast %55 : vector<1x8x128xbf16> to vector<8x128xbf16>
    %57 = arith.extf %56 : vector<8x128xbf16> to vector<8x128xf32>
    %58 = arith.truncf %49 : vector<8x128xf32> to vector<8x128xbf16>
    %cst_27 = arith.constant dense<0.000000e+00> : vector<8x128xf32>
    %59 = tpu.matmul %58, %3, %cst_27 {dimension_numbers = #tpu.dot_dimension_numbers<[1], [0], [0], [1], [0, 0, 1, 1], [], []>} : vector<8x128xbf16>, vector<128x128xbf16>, vector<8x128xf32> -> vector<8x128xf32>
    %60 = arith.addf %57, %59 : vector<8x128xf32>
    %61 = math.tanh %60 : vector<8x128xf32>
    %62 = arith.index_cast %c4_i32 : i32 to index
    %c0_28 = arith.constant 0 : index
    %c0_29 = arith.constant 0 : index
    %63 = vector.load %arg11[%62, %c0_28, %c0_29] : memref<8x8x128xf32, #tpu.memory_space<vmem>>, vector<1x8x128xf32>
    %64 = vector.shape_cast %63 : vector<1x8x128xf32> to vector<8x128xf32>
    %65 = vector.shape_cast %61 : vector<8x128xf32> to vector<1x8x128xf32>
    tpu.vector_store %arg11[%62, %c0_28, %c0_29], %65 {strides = array<i32>} : memref<8x8x128xf32, #tpu.memory_space<vmem>>, vector<1x8x128xf32>,
    %c5_i32 = arith.constant 5 : i32
    %66 = arith.index_cast %c5_i32 : i32 to index
    %c0_30 = arith.constant 0 : index
    %c0_31 = arith.constant 0 : index
    %67 = vector.load %arg2[%66, %c0_30, %c0_31] : memref<8x8x128xbf16, #tpu.memory_space<vmem>>, vector<1x8x128xbf16>
    %68 = vector.shape_cast %67 : vector<1x8x128xbf16> to vector<8x128xbf16>
    %69 = arith.extf %68 : vector<8x128xbf16> to vector<8x128xf32>
    %70 = arith.truncf %61 : vector<8x128xf32> to vector<8x128xbf16>
    %cst_32 = arith.constant dense<0.000000e+00> : vector<8x128xf32>
    %71 = tpu.matmul %70, %3, %cst_32 {dimension_numbers = #tpu.dot_dimension_numbers<[1], [0], [0], [1], [0, 0, 1, 1], [], []>} : vector<8x128xbf16>, vector<128x128xbf16>, vector<8x128xf32> -> vector<8x128xf32>
    %72 = arith.addf %69, %71 : vector<8x128xf32>
    %73 = math.tanh %72 : vector<8x128xf32>
    %74 = arith.index_cast %c5_i32 : i32 to index
    %c0_33 = arith.constant 0 : index
    %c0_34 = arith.constant 0 : index
    %75 = vector.load %arg11[%74, %c0_33, %c0_34] : memref<8x8x128xf32, #tpu.memory_space<vmem>>, vector<1x8x128xf32>
    %76 = vector.shape_cast %75 : vector<1x8x128xf32> to vector<8x128xf32>
    %77 = vector.shape_cast %73 : vector<8x128xf32> to vector<1x8x128xf32>
    tpu.vector_store %arg11[%74, %c0_33, %c0_34], %77 {strides = array<i32>} : memref<8x8x128xf32, #tpu.memory_space<vmem>>, vector<1x8x128xf32>,
    %c6_i32 = arith.constant 6 : i32
    %78 = arith.index_cast %c6_i32 : i32 to index
    %c0_35 = arith.constant 0 : index
    %c0_36 = arith.constant 0 : index
    %79 = vector.load %arg2[%78, %c0_35, %c0_36] : memref<8x8x128xbf16, #tpu.memory_space<vmem>>, vector<1x8x128xbf16>
    %80 = vector.shape_cast %79 : vector<1x8x128xbf16> to vector<8x128xbf16>
    %81 = arith.extf %80 : vector<8x128xbf16> to vector<8x128xf32>
    %82 = arith.truncf %73 : vector<8x128xf32> to vector<8x128xbf16>
    %cst_37 = arith.constant dense<0.000000e+00> : vector<8x128xf32>
    %83 = tpu.matmul %82, %3, %cst_37 {dimension_numbers = #tpu.dot_dimension_numbers<[1], [0], [0], [1], [0, 0, 1, 1], [], []>} : vector<8x128xbf16>, vector<128x128xbf16>, vector<8x128xf32> -> vector<8x128xf32>
    %84 = arith.addf %81, %83 : vector<8x128xf32>
    %85 = math.tanh %84 : vector<8x128xf32>
    %86 = arith.index_cast %c6_i32 : i32 to index
    %c0_38 = arith.constant 0 : index
    %c0_39 = arith.constant 0 : index
    %87 = vector.load %arg11[%86, %c0_38, %c0_39] : memref<8x8x128xf32, #tpu.memory_space<vmem>>, vector<1x8x128xf32>
    %88 = vector.shape_cast %87 : vector<1x8x128xf32> to vector<8x128xf32>
    %89 = vector.shape_cast %85 : vector<8x128xf32> to vector<1x8x128xf32>
    tpu.vector_store %arg11[%86, %c0_38, %c0_39], %89 {strides = array<i32>} : memref<8x8x128xf32, #tpu.memory_space<vmem>>, vector<1x8x128xf32>,
    %c7_i32 = arith.constant 7 : i32
    %90 = arith.index_cast %c7_i32 : i32 to index
    %c0_40 = arith.constant 0 : index
    %c0_41 = arith.constant 0 : index
    %91 = vector.load %arg2[%90, %c0_40, %c0_41] : memref<8x8x128xbf16, #tpu.memory_space<vmem>>, vector<1x8x128xbf16>
    %92 = vector.shape_cast %91 : vector<1x8x128xbf16> to vector<8x128xbf16>
    %93 = arith.extf %92 : vector<8x128xbf16> to vector<8x128xf32>
    %94 = arith.truncf %85 : vector<8x128xf32> to vector<8x128xbf16>
    %cst_42 = arith.constant dense<0.000000e+00> : vector<8x128xf32>
    %95 = tpu.matmul %94, %3, %cst_42 {dimension_numbers = #tpu.dot_dimension_numbers<[1], [0], [0], [1], [0, 0, 1, 1], [], []>} : vector<8x128xbf16>, vector<128x128xbf16>, vector<8x128xf32> -> vector<8x128xf32>
    %96 = arith.addf %93, %95 : vector<8x128xf32>
    %97 = math.tanh %96 : vector<8x128xf32>
    %98 = arith.index_cast %c7_i32 : i32 to index
    %c0_43 = arith.constant 0 : index
    %c0_44 = arith.constant 0 : index
    %99 = vector.load %arg11[%98, %c0_43, %c0_44] : memref<8x8x128xf32, #tpu.memory_space<vmem>>, vector<1x8x128xf32>
    %100 = vector.shape_cast %99 : vector<1x8x128xf32> to vector<8x128xf32>
    %101 = vector.shape_cast %97 : vector<8x128xf32> to vector<1x8x128xf32>
    tpu.vector_store %arg11[%98, %c0_43, %c0_44], %101 {strides = array<i32>} : memref<8x8x128xf32, #tpu.memory_space<vmem>>, vector<1x8x128xf32>,
    %c8_i32 = arith.constant 8 : i32
    %c0_45 = arith.constant 0 : index
    %c0_46 = arith.constant 0 : index
    %c0_47 = arith.constant 0 : index
    %102 = vector.load %arg9[%c0_45, %c0_46, %c0_47] : memref<2x8x128xf32, #tpu.memory_space<vmem>>, vector<1x8x128xf32>
    %103 = vector.shape_cast %102 : vector<1x8x128xf32> to vector<8x128xf32>
    %104 = vector.shape_cast %97 : vector<8x128xf32> to vector<1x8x128xf32>
    tpu.vector_store %arg9[%c0_45, %c0_46, %c0_47], %104 {strides = array<i32>} : memref<2x8x128xf32, #tpu.memory_space<vmem>>, vector<1x8x128xf32>,
    %c0_48 = arith.constant 0 : index
    %c0_49 = arith.constant 0 : index
    %105 = vector.load %arg5[%c0_48, %c0_49] : memref<128x128xbf16, #tpu.memory_space<vmem>>, vector<128x128xbf16>
    %c0_50 = arith.constant 0 : index
    %c0_51 = arith.constant 0 : index
    %106 = vector.load %arg7[%c0_50, %c0_51] : memref<1x128xf32, #tpu.memory_space<vmem>>, vector<1x128xf32>
    %c0_52 = arith.constant 0 : index
    %c0_53 = arith.constant 0 : index
    %c0_54 = arith.constant 0 : index
    %107 = vector.load %arg11[%c0_52, %c0_53, %c0_54] : memref<8x8x128xf32, #tpu.memory_space<vmem>>, vector<8x8x128xf32>
    %108 = vector.shape_cast %107 : vector<8x8x128xf32> to vector<64x128xf32>
    %109 = arith.truncf %108 : vector<64x128xf32> to vector<64x128xbf16>
    %cst_55 = arith.constant dense<0.000000e+00> : vector<64x128xf32>
    %110 = tpu.matmul %109, %105, %cst_55 {dimension_numbers = #tpu.dot_dimension_numbers<[1], [0], [0], [1], [0, 0, 1, 1], [], []>} : vector<64x128xbf16>, vector<128x128xbf16>, vector<64x128xf32> -> vector<64x128xf32>
    %111 = vector.broadcast %106 : vector<1x128xf32> to vector<64x128xf32>
    %112 = arith.addf %110, %111 : vector<64x128xf32>
    %113 = vector.shape_cast %112 : vector<64x128xf32> to vector<8x8x128xf32>
    %c0_56 = arith.constant 0 : index
    %c0_57 = arith.constant 0 : index
    %c0_58 = arith.constant 0 : index
    %114 = vector.load %arg10[%c0_56, %c0_57, %c0_58] : memref<8x8x128xf32, #tpu.memory_space<vmem>>, vector<8x8x128xf32>
    tpu.vector_store %arg10[%c0_56, %c0_57, %c0_58], %113 {strides = array<i32>} : memref<8x8x128xf32, #tpu.memory_space<vmem>>, vector<8x8x128xf32>,
    %c0_59 = arith.constant 0 : index
    %c0_60 = arith.constant 0 : index
    %115 = vector.load %arg6[%c0_59, %c0_60] : memref<128x128xbf16, #tpu.memory_space<vmem>>, vector<128x128xbf16>
    %c1 = arith.constant 1 : index
    %c0_61 = arith.constant 0 : index
    %c0_62 = arith.constant 0 : index
    %116 = vector.load %arg9[%c1, %c0_61, %c0_62] : memref<2x8x128xf32, #tpu.memory_space<vmem>>, vector<1x8x128xf32>
    %117 = vector.shape_cast %116 : vector<1x8x128xf32> to vector<8x128xf32>
    %c0_i32_63 = arith.constant 0 : i32
    %118 = arith.index_cast %c0_i32_63 : i32 to index
    %c0_64 = arith.constant 0 : index
    %c0_65 = arith.constant 0 : index
    %119 = vector.load %arg10[%118, %c0_64, %c0_65] : memref<8x8x128xf32, #tpu.memory_space<vmem>>, vector<1x8x128xf32>
    %120 = vector.shape_cast %119 : vector<1x8x128xf32> to vector<8x128xf32>
    %121 = arith.truncf %117 : vector<8x128xf32> to vector<8x128xbf16>
    %cst_66 = arith.constant dense<0.000000e+00> : vector<8x128xf32>
    %122 = tpu.matmul %121, %115, %cst_66 {dimension_numbers = #tpu.dot_dimension_numbers<[1], [0], [0], [1], [0, 0, 1, 1], [], []>} : vector<8x128xbf16>, vector<128x128xbf16>, vector<8x128xf32> -> vector<8x128xf32>
    %123 = arith.addf %120, %122 : vector<8x128xf32>
    %124 = math.tanh %123 : vector<8x128xf32>
    %125 = arith.truncf %124 : vector<8x128xf32> to vector<8x128xbf16>
    %126 = arith.index_cast %c0_i32_63 : i32 to index
    %c0_67 = arith.constant 0 : index
    %c0_68 = arith.constant 0 : index
    %127 = vector.load %arg8[%126, %c0_67, %c0_68] : memref<8x8x128xbf16, #tpu.memory_space<vmem>>, vector<1x8x128xbf16>
    %128 = vector.shape_cast %127 : vector<1x8x128xbf16> to vector<8x128xbf16>
    %129 = vector.shape_cast %125 : vector<8x128xbf16> to vector<1x8x128xbf16>
    tpu.vector_store %arg8[%126, %c0_67, %c0_68], %129 {strides = array<i32>} : memref<8x8x128xbf16, #tpu.memory_space<vmem>>, vector<1x8x128xbf16>,
    %c1_i32_69 = arith.constant 1 : i32
    %130 = arith.index_cast %c1_i32_69 : i32 to index
    %c0_70 = arith.constant 0 : index
    %c0_71 = arith.constant 0 : index
    %131 = vector.load %arg10[%130, %c0_70, %c0_71] : memref<8x8x128xf32, #tpu.memory_space<vmem>>, vector<1x8x128xf32>
    %132 = vector.shape_cast %131 : vector<1x8x128xf32> to vector<8x128xf32>
    %133 = arith.truncf %124 : vector<8x128xf32> to vector<8x128xbf16>
    %cst_72 = arith.constant dense<0.000000e+00> : vector<8x128xf32>
    %134 = tpu.matmul %133, %115, %cst_72 {dimension_numbers = #tpu.dot_dimension_numbers<[1], [0], [0], [1], [0, 0, 1, 1], [], []>} : vector<8x128xbf16>, vector<128x128xbf16>, vector<8x128xf32> -> vector<8x128xf32>
    %135 = arith.addf %132, %134 : vector<8x128xf32>
    %136 = math.tanh %135 : vector<8x128xf32>
    %137 = arith.truncf %136 : vector<8x128xf32> to vector<8x128xbf16>
    %138 = arith.index_cast %c1_i32_69 : i32 to index
    %c0_73 = arith.constant 0 : index
    %c0_74 = arith.constant 0 : index
    %139 = vector.load %arg8[%138, %c0_73, %c0_74] : memref<8x8x128xbf16, #tpu.memory_space<vmem>>, vector<1x8x128xbf16>
    %140 = vector.shape_cast %139 : vector<1x8x128xbf16> to vector<8x128xbf16>
    %141 = vector.shape_cast %137 : vector<8x128xbf16> to vector<1x8x128xbf16>
    tpu.vector_store %arg8[%138, %c0_73, %c0_74], %141 {strides = array<i32>} : memref<8x8x128xbf16, #tpu.memory_space<vmem>>, vector<1x8x128xbf16>,
    %c2_i32_75 = arith.constant 2 : i32
    %142 = arith.index_cast %c2_i32_75 : i32 to index
    %c0_76 = arith.constant 0 : index
    %c0_77 = arith.constant 0 : index
    %143 = vector.load %arg10[%142, %c0_76, %c0_77] : memref<8x8x128xf32, #tpu.memory_space<vmem>>, vector<1x8x128xf32>
    %144 = vector.shape_cast %143 : vector<1x8x128xf32> to vector<8x128xf32>
    %145 = arith.truncf %136 : vector<8x128xf32> to vector<8x128xbf16>
    %cst_78 = arith.constant dense<0.000000e+00> : vector<8x128xf32>
    %146 = tpu.matmul %145, %115, %cst_78 {dimension_numbers = #tpu.dot_dimension_numbers<[1], [0], [0], [1], [0, 0, 1, 1], [], []>} : vector<8x128xbf16>, vector<128x128xbf16>, vector<8x128xf32> -> vector<8x128xf32>
    %147 = arith.addf %144, %146 : vector<8x128xf32>
    %148 = math.tanh %147 : vector<8x128xf32>
    %149 = arith.truncf %148 : vector<8x128xf32> to vector<8x128xbf16>
    %150 = arith.index_cast %c2_i32_75 : i32 to index
    %c0_79 = arith.constant 0 : index
    %c0_80 = arith.constant 0 : index
    %151 = vector.load %arg8[%150, %c0_79, %c0_80] : memref<8x8x128xbf16, #tpu.memory_space<vmem>>, vector<1x8x128xbf16>
    %152 = vector.shape_cast %151 : vector<1x8x128xbf16> to vector<8x128xbf16>
    %153 = vector.shape_cast %149 : vector<8x128xbf16> to vector<1x8x128xbf16>
    tpu.vector_store %arg8[%150, %c0_79, %c0_80], %153 {strides = array<i32>} : memref<8x8x128xbf16, #tpu.memory_space<vmem>>, vector<1x8x128xbf16>,
    %c3_i32_81 = arith.constant 3 : i32
    %154 = arith.index_cast %c3_i32_81 : i32 to index
    %c0_82 = arith.constant 0 : index
    %c0_83 = arith.constant 0 : index
    %155 = vector.load %arg10[%154, %c0_82, %c0_83] : memref<8x8x128xf32, #tpu.memory_space<vmem>>, vector<1x8x128xf32>
    %156 = vector.shape_cast %155 : vector<1x8x128xf32> to vector<8x128xf32>
    %157 = arith.truncf %148 : vector<8x128xf32> to vector<8x128xbf16>
    %cst_84 = arith.constant dense<0.000000e+00> : vector<8x128xf32>
    %158 = tpu.matmul %157, %115, %cst_84 {dimension_numbers = #tpu.dot_dimension_numbers<[1], [0], [0], [1], [0, 0, 1, 1], [], []>} : vector<8x128xbf16>, vector<128x128xbf16>, vector<8x128xf32> -> vector<8x128xf32>
    %159 = arith.addf %156, %158 : vector<8x128xf32>
    %160 = math.tanh %159 : vector<8x128xf32>
    %161 = arith.truncf %160 : vector<8x128xf32> to vector<8x128xbf16>
    %162 = arith.index_cast %c3_i32_81 : i32 to index
    %c0_85 = arith.constant 0 : index
    %c0_86 = arith.constant 0 : index
    %163 = vector.load %arg8[%162, %c0_85, %c0_86] : memref<8x8x128xbf16, #tpu.memory_space<vmem>>, vector<1x8x128xbf16>
    %164 = vector.shape_cast %163 : vector<1x8x128xbf16> to vector<8x128xbf16>
    %165 = vector.shape_cast %161 : vector<8x128xbf16> to vector<1x8x128xbf16>
    tpu.vector_store %arg8[%162, %c0_85, %c0_86], %165 {strides = array<i32>} : memref<8x8x128xbf16, #tpu.memory_space<vmem>>, vector<1x8x128xbf16>,
    %c4_i32_87 = arith.constant 4 : i32
    %166 = arith.index_cast %c4_i32_87 : i32 to index
    %c0_88 = arith.constant 0 : index
    %c0_89 = arith.constant 0 : index
    %167 = vector.load %arg10[%166, %c0_88, %c0_89] : memref<8x8x128xf32, #tpu.memory_space<vmem>>, vector<1x8x128xf32>
    %168 = vector.shape_cast %167 : vector<1x8x128xf32> to vector<8x128xf32>
    %169 = arith.truncf %160 : vector<8x128xf32> to vector<8x128xbf16>
    %cst_90 = arith.constant dense<0.000000e+00> : vector<8x128xf32>
    %170 = tpu.matmul %169, %115, %cst_90 {dimension_numbers = #tpu.dot_dimension_numbers<[1], [0], [0], [1], [0, 0, 1, 1], [], []>} : vector<8x128xbf16>, vector<128x128xbf16>, vector<8x128xf32> -> vector<8x128xf32>
    %171 = arith.addf %168, %170 : vector<8x128xf32>
    %172 = math.tanh %171 : vector<8x128xf32>
    %173 = arith.truncf %172 : vector<8x128xf32> to vector<8x128xbf16>
    %174 = arith.index_cast %c4_i32_87 : i32 to index
    %c0_91 = arith.constant 0 : index
    %c0_92 = arith.constant 0 : index
    %175 = vector.load %arg8[%174, %c0_91, %c0_92] : memref<8x8x128xbf16, #tpu.memory_space<vmem>>, vector<1x8x128xbf16>
    %176 = vector.shape_cast %175 : vector<1x8x128xbf16> to vector<8x128xbf16>
    %177 = vector.shape_cast %173 : vector<8x128xbf16> to vector<1x8x128xbf16>
    tpu.vector_store %arg8[%174, %c0_91, %c0_92], %177 {strides = array<i32>} : memref<8x8x128xbf16, #tpu.memory_space<vmem>>, vector<1x8x128xbf16>,
    %c5_i32_93 = arith.constant 5 : i32
    %178 = arith.index_cast %c5_i32_93 : i32 to index
    %c0_94 = arith.constant 0 : index
    %c0_95 = arith.constant 0 : index
    %179 = vector.load %arg10[%178, %c0_94, %c0_95] : memref<8x8x128xf32, #tpu.memory_space<vmem>>, vector<1x8x128xf32>
    %180 = vector.shape_cast %179 : vector<1x8x128xf32> to vector<8x128xf32>
    %181 = arith.truncf %172 : vector<8x128xf32> to vector<8x128xbf16>
    %cst_96 = arith.constant dense<0.000000e+00> : vector<8x128xf32>
    %182 = tpu.matmul %181, %115, %cst_96 {dimension_numbers = #tpu.dot_dimension_numbers<[1], [0], [0], [1], [0, 0, 1, 1], [], []>} : vector<8x128xbf16>, vector<128x128xbf16>, vector<8x128xf32> -> vector<8x128xf32>
    %183 = arith.addf %180, %182 : vector<8x128xf32>
    %184 = math.tanh %183 : vector<8x128xf32>
    %185 = arith.truncf %184 : vector<8x128xf32> to vector<8x128xbf16>
    %186 = arith.index_cast %c5_i32_93 : i32 to index
    %c0_97 = arith.constant 0 : index
    %c0_98 = arith.constant 0 : index
    %187 = vector.load %arg8[%186, %c0_97, %c0_98] : memref<8x8x128xbf16, #tpu.memory_space<vmem>>, vector<1x8x128xbf16>
    %188 = vector.shape_cast %187 : vector<1x8x128xbf16> to vector<8x128xbf16>
    %189 = vector.shape_cast %185 : vector<8x128xbf16> to vector<1x8x128xbf16>
    tpu.vector_store %arg8[%186, %c0_97, %c0_98], %189 {strides = array<i32>} : memref<8x8x128xbf16, #tpu.memory_space<vmem>>, vector<1x8x128xbf16>,
    %c6_i32_99 = arith.constant 6 : i32
    %190 = arith.index_cast %c6_i32_99 : i32 to index
    %c0_100 = arith.constant 0 : index
    %c0_101 = arith.constant 0 : index
    %191 = vector.load %arg10[%190, %c0_100, %c0_101] : memref<8x8x128xf32, #tpu.memory_space<vmem>>, vector<1x8x128xf32>
    %192 = vector.shape_cast %191 : vector<1x8x128xf32> to vector<8x128xf32>
    %193 = arith.truncf %184 : vector<8x128xf32> to vector<8x128xbf16>
    %cst_102 = arith.constant dense<0.000000e+00> : vector<8x128xf32>
    %194 = tpu.matmul %193, %115, %cst_102 {dimension_numbers = #tpu.dot_dimension_numbers<[1], [0], [0], [1], [0, 0, 1, 1], [], []>} : vector<8x128xbf16>, vector<128x128xbf16>, vector<8x128xf32> -> vector<8x128xf32>
    %195 = arith.addf %192, %194 : vector<8x128xf32>
    %196 = math.tanh %195 : vector<8x128xf32>
    %197 = arith.truncf %196 : vector<8x128xf32> to vector<8x128xbf16>
    %198 = arith.index_cast %c6_i32_99 : i32 to index
    %c0_103 = arith.constant 0 : index
    %c0_104 = arith.constant 0 : index
    %199 = vector.load %arg8[%198, %c0_103, %c0_104] : memref<8x8x128xbf16, #tpu.memory_space<vmem>>, vector<1x8x128xbf16>
    %200 = vector.shape_cast %199 : vector<1x8x128xbf16> to vector<8x128xbf16>
    %201 = vector.shape_cast %197 : vector<8x128xbf16> to vector<1x8x128xbf16>
    tpu.vector_store %arg8[%198, %c0_103, %c0_104], %201 {strides = array<i32>} : memref<8x8x128xbf16, #tpu.memory_space<vmem>>, vector<1x8x128xbf16>,
    %c7_i32_105 = arith.constant 7 : i32
    %202 = arith.index_cast %c7_i32_105 : i32 to index
    %c0_106 = arith.constant 0 : index
    %c0_107 = arith.constant 0 : index
    %203 = vector.load %arg10[%202, %c0_106, %c0_107] : memref<8x8x128xf32, #tpu.memory_space<vmem>>, vector<1x8x128xf32>
    %204 = vector.shape_cast %203 : vector<1x8x128xf32> to vector<8x128xf32>
    %205 = arith.truncf %196 : vector<8x128xf32> to vector<8x128xbf16>
    %cst_108 = arith.constant dense<0.000000e+00> : vector<8x128xf32>
    %206 = tpu.matmul %205, %115, %cst_108 {dimension_numbers = #tpu.dot_dimension_numbers<[1], [0], [0], [1], [0, 0, 1, 1], [], []>} : vector<8x128xbf16>, vector<128x128xbf16>, vector<8x128xf32> -> vector<8x128xf32>
    %207 = arith.addf %204, %206 : vector<8x128xf32>
    %208 = math.tanh %207 : vector<8x128xf32>
    %209 = arith.truncf %208 : vector<8x128xf32> to vector<8x128xbf16>
    %210 = arith.index_cast %c7_i32_105 : i32 to index
    %c0_109 = arith.constant 0 : index
    %c0_110 = arith.constant 0 : index
    %211 = vector.load %arg8[%210, %c0_109, %c0_110] : memref<8x8x128xbf16, #tpu.memory_space<vmem>>, vector<1x8x128xbf16>
    %212 = vector.shape_cast %211 : vector<1x8x128xbf16> to vector<8x128xbf16>
    %213 = vector.shape_cast %209 : vector<8x128xbf16> to vector<1x8x128xbf16>
    tpu.vector_store %arg8[%210, %c0_109, %c0_110], %213 {strides = array<i32>} : memref<8x8x128xbf16, #tpu.memory_space<vmem>>, vector<1x8x128xbf16>,
    %c8_i32_111 = arith.constant 8 : i32
    %c1_112 = arith.constant 1 : index
    %c0_113 = arith.constant 0 : index
    %c0_114 = arith.constant 0 : index
    %214 = vector.load %arg9[%c1_112, %c0_113, %c0_114] : memref<2x8x128xf32, #tpu.memory_space<vmem>>, vector<1x8x128xf32>
    %215 = vector.shape_cast %214 : vector<1x8x128xf32> to vector<8x128xf32>
    %216 = vector.shape_cast %208 : vector<8x128xf32> to vector<1x8x128xf32>
    tpu.vector_store %arg9[%c1_112, %c0_113, %c0_114], %216 {strides = array<i32>} : memref<2x8x128xf32, #tpu.memory_space<vmem>>, vector<1x8x128xf32>,
    return
  }
  func.func @transform_0(%arg0: i32, %arg1: i32) -> (i32, i32, i32) {
    %c0_i32 = arith.constant 0 : i32
    %c0_i32_0 = arith.constant 0 : i32
    return %arg1, %arg0, %c0_i32 : i32, i32, i32
  }
  func.func @transform_1(%arg0: i32, %arg1: i32) -> (i32, i32, i32) {
    %c0_i32 = arith.constant 0 : i32
    %c0_i32_0 = arith.constant 0 : i32
    %c0_i32_1 = arith.constant 0 : i32
    return %c0_i32, %arg0, %c0_i32_0 : i32, i32, i32
  }
  func.func @transform_2(%arg0: i32, %arg1: i32) -> (i32, i32) {
    %c0_i32 = arith.constant 0 : i32
    %c0_i32_0 = arith.constant 0 : i32
    %c0_i32_1 = arith.constant 0 : i32
    return %c0_i32, %c0_i32_0 : i32, i32
  }
  func.func @transform_3(%arg0: i32, %arg1: i32) -> (i32, i32) {
    %c0_i32 = arith.constant 0 : i32
    %c0_i32_0 = arith.constant 0 : i32
    %c0_i32_1 = arith.constant 0 : i32
    return %c0_i32, %c0_i32_0 : i32, i32
  }
  func.func @transform_4(%arg0: i32, %arg1: i32) -> (i32, i32) {
    %c0_i32 = arith.constant 0 : i32
    %c0_i32_0 = arith.constant 0 : i32
    %c0_i32_1 = arith.constant 0 : i32
    return %c0_i32, %c0_i32_0 : i32, i32
  }
  func.func @transform_5(%arg0: i32, %arg1: i32) -> (i32, i32) {
    %c0_i32 = arith.constant 0 : i32
    %c0_i32_0 = arith.constant 0 : i32
    %c0_i32_1 = arith.constant 0 : i32
    return %c0_i32, %c0_i32_0 : i32, i32
  }
  func.func @transform_6(%arg0: i32, %arg1: i32) -> (i32, i32, i32) {
    %c0_i32 = arith.constant 0 : i32
    %c0_i32_0 = arith.constant 0 : i32
    return %arg1, %arg0, %c0_i32 : i32, i32, i32
  }
  func.func @transform_7(%arg0: i32, %arg1: i32) -> (i32, i32, i32) {
    %c0_i32 = arith.constant 0 : i32
    %c0_i32_0 = arith.constant 0 : i32
    %c0_i32_1 = arith.constant 0 : i32
    return %c0_i32, %arg0, %c0_i32_0 : i32, i32, i32
  }
}

</mosaic_0001>

<bundles_post_ra>
// kernel: rnn_language_model_forward.1
= control target key start
LH: loop header
LB: loop body
LE: loop exit
PB: predicated region body
PF: predicated region fallthrough
CT: control target
= control target key end

     0   :  { %v1687_v0 = vmov 0.0   ;;  %vm1688_vm0 = vmmov 0   ;;  %s2220_s2 = inlined_call_operand.vmem [shape: bf16[128,128], index: 2, kind: input, shape index: {}]   ;;  %s2221_s1 = inlined_call_operand.vmem [shape: f32[2,8,128], index: 1, kind: input, shape index: {}, may-alias: {1,7}]   ;;  %s2222_s0 = inlined_call_operand.vmem [shape: bf16[8,8,128], index: 0, kind: input, shape index: {}]   ;;  %s2223_s3 = inlined_call_operand.vmem [shape: bf16[128,128], index: 3, kind: input, shape index: {}]   ;;  %s2224_s4 = inlined_call_operand.vmem [shape: bf16[128,128], index: 4, kind: input, shape index: {}]   ;;  %s2225_s7 = inlined_call_operand.vmem [shape: f32[2,8,128], index: 7, kind: output, shape index: {1}, may-alias: {1,7}]   ;;  %s2226_s5 = inlined_call_operand.vmem [shape: f32[1,128], index: 5, kind: input, shape index: {}]   ;;  %s2227_s6 = inlined_call_operand.vmem [shape: bf16[8,8,128], index: 6, kind: output, shape index: {0}]  }
   0x1   :  { %1285 = vmatprep.subr.bf16.mxu0 %v1687_v0  ;;  %v1733_v1 = vld [vmem:[%s2220_s2 + $0x38] sm:$0xff]   ;;  %1301 = vmatprep.mubr.msk.bf16.mxu0 %vm1688_vm0, %v1687_v0  ;;  %v1744_v2 = vld [vmem:[%s2220_s2 + $0x30] sm:$0xff]   ;;  %v1753_v3 = vld [vmem:[%s2220_s2 + $0x28] sm:$0xff]  }
   0x2   :  { %1305 = vmatprep.subr.bf16.mxu1 %v1687_v0  ;;  %1321 = vmatprep.mubr.msk.bf16.mxu1 %vm1688_vm0, %v1687_v0  ;;  %v1762_v4 = vld [vmem:[%s2220_s2 + $0x20] sm:$0xff]   ;;  %v1771_v5 = vld [vmem:[%s2220_s2 + $0x18] sm:$0xff]   ;;  %v1780_v6 = vld [vmem:[%s2220_s2 + $0x10] sm:$0xff]  }
   0x3   :  { %1286 = vmatpush3.bf16.msra.mxu0 %v1733_v1  ;;  %1306 = vmatpush3.bf16.msra.mxu1 %v1733_v1  ;;  %v1789_v7 = vld [vmem:[%s2220_s2 + $0x8] sm:$0xff]   ;;  %v1798_v8 = vld [vmem:[%s2220_s2] sm:$0xff]   ;;  %v1099_v45 = vld [vmem:[%s2222_s0 + $0x10] sm:$0xff]  }
   0x4   :  { %1287 = vmatprep.subr.bf16.mxu0 %v1687_v0  ;;  %1307 = vmatprep.subr.bf16.mxu1 %v1687_v0  ;;  %v30_v9 = vld [vmem:[%s2221_s1] sm:$0xff]  ;;  %v1097_v28 = vld [vmem:[%s2222_s0 + $0x8] sm:$0xff]   ;;  %v291_v46 = vunpack.c.l.bf16 %v1099_v45  ;;  %v1639_v54 = vld [vmem:[%s2223_s3 + $0x38] sm:$0xff]   ;;  %v339_v55 = vunpack.c.h.bf16 %v1099_v45 }
   0x5   :  { %v53_v10 = vpack.c.bf16 %v30_v9, %v30_v9  ;;  %v51_v11 = vld [vmem:[%s2222_s0] sm:$0xff]   ;;  %v195_v29 = vunpack.c.l.bf16 %v1097_v28  ;;  %v243_v37 = vunpack.c.h.bf16 %v1097_v28  ;;  %v1640_v63 = vld [vmem:[%s2223_s3 + $0x30] sm:$0xff]  }
   0x6   :  { %v52_v12 = vunpack.c.l.bf16 %v51_v11  ;;  %v147_v20 = vunpack.c.h.bf16 %v51_v11  ;;  %v1980_v11 = vld [vmem:[%s2224_s4 + $0x30] sm:$0xff]  }
   0x7   :  { %1288 = vmatpush3.bf16.msra.mxu0 %v1744_v2  ;;  %1308 = vmatpush3.bf16.msra.mxu1 %v1744_v2 }
   0x8   :  { %1289 = vmatprep.subr.bf16.mxu0 %v1687_v0  ;;  %1309 = vmatprep.subr.bf16.mxu1 %v1687_v0 }
   0xb   :  { %1290 = vmatpush3.bf16.msra.mxu0 %v1753_v3  ;;  %1310 = vmatpush3.bf16.msra.mxu1 %v1753_v3 }
   0xc   :  { %1291 = vmatprep.subr.bf16.mxu0 %v1687_v0  ;;  %1311 = vmatprep.subr.bf16.mxu1 %v1687_v0 }
   0xf   :  { %1292 = vmatpush3.bf16.msra.mxu0 %v1762_v4  ;;  %1312 = vmatpush3.bf16.msra.mxu1 %v1762_v4 }
  0x10   :  { %1293 = vmatprep.subr.bf16.mxu0 %v1687_v0  ;;  %1313 = vmatprep.subr.bf16.mxu1 %v1687_v0 }
  0x13   :  { %1294 = vmatpush3.bf16.msra.mxu0 %v1771_v5  ;;  %1314 = vmatpush3.bf16.msra.mxu1 %v1771_v5 }
  0x14   :  { %1295 = vmatprep.subr.bf16.mxu0 %v1687_v0  ;;  %1315 = vmatprep.subr.bf16.mxu1 %v1687_v0 }
  0x17   :  { %1296 = vmatpush3.bf16.msra.mxu0 %v1780_v6  ;;  %1316 = vmatpush3.bf16.msra.mxu1 %v1780_v6 }
  0x18   :  { %1297 = vmatprep.subr.bf16.mxu0 %v1687_v0  ;;  %1317 = vmatprep.subr.bf16.mxu1 %v1687_v0 }
  0x1b   :  { %1298 = vmatpush3.bf16.msra.mxu0 %v1789_v7  ;;  %1318 = vmatpush3.bf16.msra.mxu1 %v1789_v7 }
  0x1c   :  { %1299 = vmatprep.subr.bf16.mxu0 %v1687_v0  ;;  %1319 = vmatprep.subr.bf16.mxu1 %v1687_v0 }
  0x1f   :  { %1300 = vmatpush3.bf16.msra.mxu0 %v1798_v8  ;;  %1320 = vmatpush3.bf16.msra.mxu1 %v1798_v8 }
  0x20   :  { %1325 = vmatprep.subr.bf16.mxu0 %v1687_v0  ;;  %1345 = vmatprep.subr.bf16.mxu1 %v1687_v0 }
  0x22   :  { %1302 = vmatmul.mubr.bf16.vlgmr.msra.gmra.mxu0 %v53_v10  ;;  %v1974_v10 = vld [vmem:[%s2224_s4 + $0x38] sm:$0xff]  }
  0x23   :  { %1326 = vmatpush3.bf16.msra.mxu0 %v1733_v1  ;;  %1341 = vmatprep.mubr.msk.bf16.mxu0 %vm1688_vm0, %v1687_v0 }
  0x24   :  { %1327 = vmatprep.subr.bf16.mxu0 %v1687_v0 }
  0x27   :  { %1328 = vmatpush3.bf16.msra.mxu0 %v1744_v2 }
  0x28   :  { %1329 = vmatprep.subr.bf16.mxu0 %v1687_v0 }
  0x2b   :  { %1330 = vmatpush3.bf16.msra.mxu0 %v1753_v3 }
  0x2c   :  { %1331 = vmatprep.subr.bf16.mxu0 %v1687_v0 }
  0x2f   :  { %1332 = vmatpush3.bf16.msra.mxu0 %v1762_v4 }
  0x30   :  { %1333 = vmatprep.subr.bf16.mxu0 %v1687_v0 }
  0x33   :  { %1334 = vmatpush3.bf16.msra.mxu0 %v1771_v5 }
  0x34   :  { %1335 = vmatprep.subr.bf16.mxu0 %v1687_v0 }
  0x37   :  { %1336 = vmatpush3.bf16.msra.mxu0 %v1780_v6 }
  0x38   :  { %1337 = vmatprep.subr.bf16.mxu0 %v1687_v0 }
  0x3b   :  { %1338 = vmatpush3.bf16.msra.mxu0 %v1789_v7 }
  0x3c   :  { %1339 = vmatprep.subr.bf16.mxu0 %v1687_v0 }
  0x3f   :  { %1340 = vmatpush3.bf16.msra.mxu0 %v1798_v8 }
  0x40   :  { %1365 = vmatprep.subr.bf16.mxu0 %v1687_v0 }
  0xe2   :  { %v136_v13 = vpop.f32.mrf.mxu0 }
  0xe3   :  { %v142_v14 = vadd.f32 %v136_v13, %v52_v12  ;;  %v1988_v12 = vld [vmem:[%s2224_s4 + $0x28] sm:$0xff]   ;;  %v1995_v13 = vld [vmem:[%s2224_s4 + $0x20] sm:$0xff]  }
  0xe4   :  { %v1303_v15 = vpop.f32.mrf.mxu0 }
  0xe5   :  { %1655 = vtanh.f32 %v142_v14  ;;  %v2002_v14 = vld [vmem:[%s2224_s4 + $0x18] sm:$0xff]   ;;  %v2009_v15 = vld [vmem:[%s2224_s4 + $0x10] sm:$0xff]  }
  0xe6   :  { %v139_v16 = vpop.f32.mrf.mxu0 }
  0xe7   :  { %v2016_v16 = vld [vmem:[%s2224_s4 + $0x8] sm:$0xff]  }
  0xe8   :  { %v1304_v17 = vpop.f32.mrf.mxu0 }
  0xe9   :  { %v2023_v17 = vld [vmem:[%s2224_s4] sm:$0xff]  }
  0xf2   :  { %v1831_v18 = vpop.eup %1655 }
  0xf3   :  { %v148_v19 = vpack.c.bf16 %v1831_v18, %v1831_v18 }
  0xf5   :  { %1322 = vmatmul.mubr.bf16.vlgmr.msra.gmra.mxu1 %v148_v19 }
  0xf6   :  { %1346 = vmatpush3.bf16.msra.mxu1 %v1733_v1  ;;  %1361 = vmatprep.mubr.msk.bf16.mxu1 %vm1688_vm0, %v1687_v0 }
  0xf7   :  { %1347 = vmatprep.subr.bf16.mxu1 %v1687_v0 }
  0xfa   :  { %1348 = vmatpush3.bf16.msra.mxu1 %v1744_v2 }
  0xfb   :  { %1349 = vmatprep.subr.bf16.mxu1 %v1687_v0 }
  0xfe   :  { %1350 = vmatpush3.bf16.msra.mxu1 %v1753_v3 }
  0xff   :  { %1351 = vmatprep.subr.bf16.mxu1 %v1687_v0 }
 0x102   :  { %1352 = vmatpush3.bf16.msra.mxu1 %v1762_v4 }
 0x103   :  { %1353 = vmatprep.subr.bf16.mxu1 %v1687_v0 }
 0x106   :  { %1354 = vmatpush3.bf16.msra.mxu1 %v1771_v5 }
 0x107   :  { %1355 = vmatprep.subr.bf16.mxu1 %v1687_v0 }
 0x10a   :  { %1356 = vmatpush3.bf16.msra.mxu1 %v1780_v6 }
 0x10b   :  { %1357 = vmatprep.subr.bf16.mxu1 %v1687_v0 }
 0x10e   :  { %1358 = vmatpush3.bf16.msra.mxu1 %v1789_v7 }
 0x10f   :  { %1359 = vmatprep.subr.bf16.mxu1 %v1687_v0 }
 0x112   :  { %1360 = vmatpush3.bf16.msra.mxu1 %v1798_v8 }
 0x113   :  { %1385 = vmatprep.subr.bf16.mxu1 %v1687_v0 }
 0x1b5   :  { %v183_v21 = vpop.f32.mrf.mxu1 }
 0x1b6   :  { %v189_v22 = vadd.f32 %v183_v21, %v147_v20 }
 0x1b7   :  { %v1323_v23 = vpop.f32.mrf.mxu1 }
 0x1b8   :  { %1657 = vtanh.f32 %v189_v22 }
 0x1b9   :  { %v186_v24 = vpop.f32.mrf.mxu1 }
 0x1bb   :  { %v1324_v25 = vpop.f32.mrf.mxu1 }
 0x1c5   :  { %v1853_v26 = vpop.eup %1657 }
 0x1c6   :  { %v196_v27 = vpack.c.bf16 %v1853_v26, %v1853_v26 }
 0x1c8   :  { %1342 = vmatmul.mubr.bf16.vlgmr.msra.gmra.mxu0 %v196_v27  ;;  %v31_v27 = vld [vmem:[%s2221_s1 + $0x8] sm:$0xff] }
 0x1c9   :  { %1366 = vmatpush3.bf16.msra.mxu0 %v1733_v1  ;;  %1381 = vmatprep.mubr.msk.bf16.mxu0 %vm1688_vm0, %v1687_v0  ;;  %v657_v28 = vpack.c.bf16 %v31_v27, %v31_v27 }
 0x1ca   :  { %1367 = vmatprep.subr.bf16.mxu0 %v1687_v0 }
 0x1cd   :  { %1368 = vmatpush3.bf16.msra.mxu0 %v1744_v2 }
 0x1ce   :  { %1369 = vmatprep.subr.bf16.mxu0 %v1687_v0 }
 0x1d1   :  { %1370 = vmatpush3.bf16.msra.mxu0 %v1753_v3 }
 0x1d2   :  { %1371 = vmatprep.subr.bf16.mxu0 %v1687_v0 }
 0x1d5   :  { %1372 = vmatpush3.bf16.msra.mxu0 %v1762_v4 }
 0x1d6   :  { %1373 = vmatprep.subr.bf16.mxu0 %v1687_v0 }
 0x1d9   :  { %1374 = vmatpush3.bf16.msra.mxu0 %v1771_v5 }
 0x1da   :  { %1375 = vmatprep.subr.bf16.mxu0 %v1687_v0 }
 0x1dd   :  { %1376 = vmatpush3.bf16.msra.mxu0 %v1780_v6 }
 0x1de   :  { %1377 = vmatprep.subr.bf16.mxu0 %v1687_v0 }
 0x1e1   :  { %1378 = vmatpush3.bf16.msra.mxu0 %v1789_v7 }
 0x1e2   :  { %1379 = vmatprep.subr.bf16.mxu0 %v1687_v0 }
 0x1e5   :  { %1380 = vmatpush3.bf16.msra.mxu0 %v1798_v8 }
 0x1e6   :  { %1405 = vmatprep.subr.bf16.mxu0 %v1687_v0 }
 0x288   :  { %v231_v30 = vpop.f32.mrf.mxu0 }
 0x289   :  { %v237_v31 = vadd.f32 %v231_v30, %v195_v29  ;;  %v1102_v29 = vld [vmem:[%s2222_s0 + $0x1c] sm:$0xf] }
 0x28a   :  { %v1343_v32 = vpop.f32.mrf.mxu0  ;;  %v435_v30 = vunpack.c.l.bf16 %v1102_v29 }
 0x28b   :  { %1659 = vtanh.f32 %v237_v31 }
 0x28c   :  { %v234_v33 = vpop.f32.mrf.mxu0 }
 0x28e   :  { %v1344_v34 = vpop.f32.mrf.mxu0 }
 0x298   :  { %v1878_v35 = vpop.eup %1659 }
 0x299   :  { %v244_v36 = vpack.c.bf16 %v1878_v35, %v1878_v35 }
 0x29b   :  { %1362 = vmatmul.mubr.bf16.vlgmr.msra.gmra.mxu1 %v244_v36 }
 0x29c   :  { %1386 = vmatpush3.bf16.msra.mxu1 %v1733_v1  ;;  %1401 = vmatprep.mubr.msk.bf16.mxu1 %vm1688_vm0, %v1687_v0 }
 0x29d   :  { %1387 = vmatprep.subr.bf16.mxu1 %v1687_v0 }
 0x2a0   :  { %1388 = vmatpush3.bf16.msra.mxu1 %v1744_v2 }
 0x2a1   :  { %1389 = vmatprep.subr.bf16.mxu1 %v1687_v0 }
 0x2a4   :  { %1390 = vmatpush3.bf16.msra.mxu1 %v1753_v3 }
 0x2a5   :  { %1391 = vmatprep.subr.bf16.mxu1 %v1687_v0 }
 0x2a8   :  { %1392 = vmatpush3.bf16.msra.mxu1 %v1762_v4 }
 0x2a9   :  { %1393 = vmatprep.subr.bf16.mxu1 %v1687_v0 }
 0x2ac   :  { %1394 = vmatpush3.bf16.msra.mxu1 %v1771_v5 }
 0x2ad   :  { %1395 = vmatprep.subr.bf16.mxu1 %v1687_v0 }
 0x2b0   :  { %1396 = vmatpush3.bf16.msra.mxu1 %v1780_v6 }
 0x2b1   :  { %1397 = vmatprep.subr.bf16.mxu1 %v1687_v0 }
 0x2b4   :  { %1398 = vmatpush3.bf16.msra.mxu1 %v1789_v7 }
 0x2b5   :  { %1399 = vmatprep.subr.bf16.mxu1 %v1687_v0 }
 0x2b8   :  { %1400 = vmatpush3.bf16.msra.mxu1 %v1798_v8 }
 0x2b9   :  { %1425 = vmatprep.subr.bf16.mxu1 %v1687_v0 }
 0x35b   :  { %v279_v38 = vpop.f32.mrf.mxu1 }
 0x35c   :  { %v285_v39 = vadd.f32 %v279_v38, %v243_v37 }
 0x35d   :  { %v1363_v40 = vpop.f32.mrf.mxu1 }
 0x35e   :  { %1661 = vtanh.f32 %v285_v39  ;;  %v2082_v40 = vld [vmem:[%s2226_s5] ss:$0 sm:$0xff] }
 0x35f   :  { %v282_v41 = vpop.f32.mrf.mxu1 }
 0x361   :  { %v1364_v42 = vpop.f32.mrf.mxu1 }
 0x36b   :  { %v1900_v43 = vpop.eup %1661 }
 0x36c   :  { %v292_v44 = vpack.c.bf16 %v1900_v43, %v1900_v43 }
 0x36e   :  { %1382 = vmatmul.mubr.bf16.vlgmr.msra.gmra.mxu0 %v292_v44 }
 0x36f   :  { %1406 = vmatpush3.bf16.msra.mxu0 %v1733_v1  ;;  %1421 = vmatprep.mubr.msk.bf16.mxu0 %vm1688_vm0, %v1687_v0 }
 0x370   :  { %1407 = vmatprep.subr.bf16.mxu0 %v1687_v0 }
 0x373   :  { %1408 = vmatpush3.bf16.msra.mxu0 %v1744_v2 }
 0x374   :  { %1409 = vmatprep.subr.bf16.mxu0 %v1687_v0 }
 0x377   :  { %1410 = vmatpush3.bf16.msra.mxu0 %v1753_v3 }
 0x378   :  { %1411 = vmatprep.subr.bf16.mxu0 %v1687_v0 }
 0x37b   :  { %1412 = vmatpush3.bf16.msra.mxu0 %v1762_v4 }
 0x37c   :  { %1413 = vmatprep.subr.bf16.mxu0 %v1687_v0 }
 0x37f   :  { %1414 = vmatpush3.bf16.msra.mxu0 %v1771_v5 }
 0x380   :  { %1415 = vmatprep.subr.bf16.mxu0 %v1687_v0 }
 0x383   :  { %1416 = vmatpush3.bf16.msra.mxu0 %v1780_v6 }
 0x384   :  { %1417 = vmatprep.subr.bf16.mxu0 %v1687_v0 }
 0x387   :  { %1418 = vmatpush3.bf16.msra.mxu0 %v1789_v7 }
 0x388   :  { %1419 = vmatprep.subr.bf16.mxu0 %v1687_v0 }
 0x38b   :  { %1420 = vmatpush3.bf16.msra.mxu0 %v1798_v8 }
 0x38c   :  { %1445 = vmatprep.subr.bf16.mxu0 %v1639_v54 }
 0x42e   :  { %v327_v47 = vpop.f32.mrf.mxu0 }
 0x42f   :  { %v333_v48 = vadd.f32 %v327_v47, %v291_v46 }
 0x430   :  { %v1383_v49 = vpop.f32.mrf.mxu0 }
 0x431   :  { %1663 = vtanh.f32 %v333_v48 }
 0x432   :  { %v330_v50 = vpop.f32.mrf.mxu0 }
 0x434   :  { %v1384_v51 = vpop.f32.mrf.mxu0 }
 0x43e   :  { %v1664_v52 = vpop.eup %1663 }
 0x43f   :  { %v340_v53 = vpack.c.bf16 %v1664_v52, %v1664_v52 }
 0x441   :  { %1402 = vmatmul.mubr.bf16.vlgmr.msra.gmra.mxu1 %v340_v53 }
 0x442   :  { %1426 = vmatpush3.bf16.msra.mxu1 %v1733_v1  ;;  %1441 = vmatprep.mubr.msk.bf16.mxu1 %vm1688_vm0, %v1687_v0  ;;  %v507_v1 = vpack.c.bf16 %v1853_v26, %v1831_v18  ;;  %v1101_v18 = vld [vmem:[%s2222_s0 + $0x18] sm:$0xf] }
 0x443   :  { %1427 = vmatprep.subr.bf16.mxu1 %v1687_v0  ;;  %v387_v19 = vunpack.c.l.bf16 %v1101_v18 }
 0x446   :  { %1428 = vmatpush3.bf16.msra.mxu1 %v1744_v2  ;;  %v1641_v2 = vld [vmem:[%s2223_s3 + $0x28] sm:$0xff]  }
 0x447   :  { %1429 = vmatprep.subr.bf16.mxu1 %v1687_v0 }
 0x44a   :  { %1430 = vmatpush3.bf16.msra.mxu1 %v1753_v3  ;;  %v1642_v3 = vld [vmem:[%s2223_s3 + $0x20] sm:$0xff]  }
 0x44b   :  { %1431 = vmatprep.subr.bf16.mxu1 %v1687_v0 }
 0x44e   :  { %1432 = vmatpush3.bf16.msra.mxu1 %v1762_v4  ;;  %v1643_v4 = vld [vmem:[%s2223_s3 + $0x18] sm:$0xff]  }
 0x44f   :  { %1433 = vmatprep.subr.bf16.mxu1 %v1687_v0 }
 0x452   :  { %1434 = vmatpush3.bf16.msra.mxu1 %v1771_v5  ;;  %v1644_v5 = vld [vmem:[%s2223_s3 + $0x10] sm:$0xff]  }
 0x453   :  { %1435 = vmatprep.subr.bf16.mxu1 %v1687_v0 }
 0x456   :  { %1436 = vmatpush3.bf16.msra.mxu1 %v1780_v6  ;;  %v1645_v6 = vld [vmem:[%s2223_s3 + $0x8] sm:$0xff]  }
 0x457   :  { %1437 = vmatprep.subr.bf16.mxu1 %v1687_v0 }
 0x45a   :  { %1438 = vmatpush3.bf16.msra.mxu1 %v1789_v7  ;;  %v1646_v7 = vld [vmem:[%s2223_s3] sm:$0xff]  }
 0x45b   :  { %1439 = vmatprep.subr.bf16.mxu1 %v1687_v0 }
 0x45e   :  { %1440 = vmatpush3.bf16.msra.mxu1 %v1798_v8  ;;  %v508_v8 = vpack.c.bf16 %v1900_v43, %v1878_v35 }
 0x45f   :  { %1469 = vmatprep.subr.bf16.mxu1 %v1687_v0 }
 0x501   :  { %v375_v56 = vpop.f32.mrf.mxu1 }
 0x502   :  { %v381_v57 = vadd.f32 %v375_v56, %v339_v55 }
 0x503   :  { %v1403_v58 = vpop.f32.mrf.mxu1 }
 0x504   :  { %1665 = vtanh.f32 %v381_v57 }
 0x505   :  { %v378_v59 = vpop.f32.mrf.mxu1 }
 0x507   :  { %v1404_v60 = vpop.f32.mrf.mxu1 }
 0x511   :  { %v1666_v61 = vpop.eup %1665 }
 0x512   :  { %v388_v62 = vpack.c.bf16 %v1666_v61, %v1666_v61  ;;  %v509_v9 = vpack.c.bf16 %v1666_v61, %v1664_v52 }
 0x514   :  { %1422 = vmatmul.mubr.bf16.vlgmr.msra.gmra.mxu0 %v388_v62 }
 0x515   :  { %1446 = vmatpush3.bf16.msra.mxu0 %v1639_v54  ;;  %1461 = vmatprep.mubr.bf16.mxu0 %v507_v1 }
 0x516   :  { %1447 = vmatprep.subr.bf16.mxu0 %v1640_v63 }
 0x519   :  { %1448 = vmatpush3.bf16.msra.mxu0 %v1640_v63 }
 0x51a   :  { %1449 = vmatprep.subr.bf16.mxu0 %v1641_v2 }
 0x51d   :  { %1450 = vmatpush3.bf16.msra.mxu0 %v1641_v2 }
 0x51e   :  { %1451 = vmatprep.subr.bf16.mxu0 %v1642_v3 }
 0x521   :  { %1452 = vmatpush3.bf16.msra.mxu0 %v1642_v3 }
 0x522   :  { %1453 = vmatprep.subr.bf16.mxu0 %v1643_v4 }
 0x525   :  { %1454 = vmatpush3.bf16.msra.mxu0 %v1643_v4 }
 0x526   :  { %1455 = vmatprep.subr.bf16.mxu0 %v1644_v5 }
 0x529   :  { %1456 = vmatpush3.bf16.msra.mxu0 %v1644_v5 }
 0x52a   :  { %1457 = vmatprep.subr.bf16.mxu0 %v1645_v6 }
 0x52d   :  { %1458 = vmatpush3.bf16.msra.mxu0 %v1645_v6 }
 0x52e   :  { %1459 = vmatprep.subr.bf16.mxu0 %v1646_v7 }
 0x531   :  { %1460 = vmatpush3.bf16.msra.mxu0 %v1646_v7 }
 0x532   :  { %1489 = vmatprep.subr.bf16.mxu0 %v1687_v0 }
 0x534   :  { %1462 = vmatmul.mubr.bf16.vlgmr.msra.gmra.mxu0 %v508_v8 }
 0x535   :  { %1465 = vmatprep.mubr.bf16.mxu0 %v509_v9  ;;  %1490 = vmatpush3.bf16.msra.mxu0 %v1974_v10 }
 0x536   :  { %1491 = vmatprep.subr.bf16.mxu0 %v1687_v0 }
 0x539   :  { %1492 = vmatpush3.bf16.msra.mxu0 %v1980_v11 }
 0x53a   :  { %1493 = vmatprep.subr.bf16.mxu0 %v1687_v0 }
 0x53d   :  { %1494 = vmatpush3.bf16.msra.mxu0 %v1988_v12 }
 0x53e   :  { %1495 = vmatprep.subr.bf16.mxu0 %v1687_v0 }
 0x541   :  { %1496 = vmatpush3.bf16.msra.mxu0 %v1995_v13 }
 0x542   :  { %1497 = vmatprep.subr.bf16.mxu0 %v1687_v0 }
 0x545   :  { %1498 = vmatpush3.bf16.msra.mxu0 %v2002_v14 }
 0x546   :  { %1499 = vmatprep.subr.bf16.mxu0 %v1687_v0 }
 0x549   :  { %1500 = vmatpush3.bf16.msra.mxu0 %v2009_v15 }
 0x54a   :  { %1501 = vmatprep.subr.bf16.mxu0 %v1687_v0 }
 0x54d   :  { %1502 = vmatpush3.bf16.msra.mxu0 %v2016_v16 }
 0x54e   :  { %1503 = vmatprep.subr.bf16.mxu0 %v1687_v0 }
 0x551   :  { %1504 = vmatpush3.bf16.msra.mxu0 %v2023_v17 }
 0x552   :  { %1529 = vmatprep.subr.bf16.mxu0 %v1687_v0 }
 0x5d4   :  { %v423_v20 = vpop.f32.mrf.mxu0 }
 0x5d5   :  { %v429_v21 = vadd.f32 %v423_v20, %v387_v19 }
 0x5d6   :  { %v1423_v22 = vpop.f32.mrf.mxu0 }
 0x5d7   :  { %1667 = vtanh.f32 %v429_v21 }
 0x5d8   :  { %v426_v23 = vpop.f32.mrf.mxu0 }
 0x5da   :  { %v1424_v24 = vpop.f32.mrf.mxu0 }
 0x5e4   :  { %v1668_v25 = vpop.eup %1667 }
 0x5e5   :  { %v436_v26 = vpack.c.bf16 %v1668_v25, %v1668_v25 }
 0x5e7   :  { %1442 = vmatmul.mubr.bf16.vlgmr.msra.gmra.mxu1 %v436_v26 }
 0x5e8   :  { %1470 = vmatpush3.bf16.msra.mxu1 %v1974_v10  ;;  %1485 = vmatprep.mubr.msk.bf16.mxu1 %vm1688_vm0, %v1687_v0 }
 0x5e9   :  { %1471 = vmatprep.subr.bf16.mxu1 %v1687_v0 }
 0x5ec   :  { %1472 = vmatpush3.bf16.msra.mxu1 %v1980_v11 }
 0x5ed   :  { %1473 = vmatprep.subr.bf16.mxu1 %v1687_v0 }
 0x5f0   :  { %1474 = vmatpush3.bf16.msra.mxu1 %v1988_v12 }
 0x5f1   :  { %1475 = vmatprep.subr.bf16.mxu1 %v1687_v0 }
 0x5f4   :  { %1476 = vmatpush3.bf16.msra.mxu1 %v1995_v13  ;;  %v2077_v38 = vpop.f32.mrf.mxu0 }
 0x5f5   :  { %1477 = vmatprep.subr.bf16.mxu1 %v1687_v0  ;;  %v608_v63 = vadd.f32 %v2077_v38, %v2082_v40 }
 0x5f6   :  { %v599_v39 = vpop.f32.mrf.mxu0 }
 0x5f7   :  { %v600_v41 = vadd.f32 %v2082_v40, %v599_v39 }
 0x5f8   :  { %1478 = vmatpush3.bf16.msra.mxu1 %v2002_v14  ;;  %v1464_v49 = vpop.f32.mrf.mxu0 }
 0x5f9   :  { %1479 = vmatprep.subr.bf16.mxu1 %v1687_v0  ;;  %v611_v8 = vadd.f32 %v1464_v49, %v2082_v40 }
 0x5fa   :  { %v602_v50 = vpop.f32.mrf.mxu0 }
 0x5fb   :  { %v603_v55 = vadd.f32 %v2082_v40, %v602_v50 }
 0x5fc   :  { %1480 = vmatpush3.bf16.msra.mxu1 %v2009_v15 }
 0x5fd   :  { %1481 = vmatprep.subr.bf16.mxu1 %v1687_v0 }
 0x600   :  { %1482 = vmatpush3.bf16.msra.mxu1 %v2016_v16 }
 0x601   :  { %1483 = vmatprep.subr.bf16.mxu1 %v1687_v0 }
 0x604   :  { %1484 = vmatpush3.bf16.msra.mxu1 %v2023_v17 }
 0x605   :  { %1509 = vmatprep.subr.bf16.mxu1 %v1687_v0 }
 0x607   :  { %1486 = vmatmul.mubr.bf16.vlgmr.msra.gmra.mxu1 %v657_v28 }
 0x608   :  { %1510 = vmatpush3.bf16.msra.mxu1 %v1974_v10  ;;  %1525 = vmatprep.mubr.msk.bf16.mxu1 %vm1688_vm0, %v1687_v0 }
 0x609   :  { %1511 = vmatprep.subr.bf16.mxu1 %v1687_v0 }
 0x60c   :  { %1512 = vmatpush3.bf16.msra.mxu1 %v1980_v11 }
 0x60d   :  { %1513 = vmatprep.subr.bf16.mxu1 %v1687_v0 }
 0x610   :  { %1514 = vmatpush3.bf16.msra.mxu1 %v1988_v12 }
 0x611   :  { %1515 = vmatprep.subr.bf16.mxu1 %v1687_v0 }
 0x614   :  { %1516 = vmatpush3.bf16.msra.mxu1 %v1995_v13 }
 0x615   :  { %1517 = vmatprep.subr.bf16.mxu1 %v1687_v0 }
 0x618   :  { %1518 = vmatpush3.bf16.msra.mxu1 %v2002_v14 }
 0x619   :  { %1519 = vmatprep.subr.bf16.mxu1 %v1687_v0 }
 0x61c   :  { %1520 = vmatpush3.bf16.msra.mxu1 %v2009_v15 }
 0x61d   :  { %1521 = vmatprep.subr.bf16.mxu1 %v1687_v0 }
 0x620   :  { %1522 = vmatpush3.bf16.msra.mxu1 %v2016_v16 }
 0x621   :  { %1523 = vmatprep.subr.bf16.mxu1 %v1687_v0 }
 0x624   :  { %1524 = vmatpush3.bf16.msra.mxu1 %v2023_v17 }
 0x625   :  { %1549 = vmatprep.subr.bf16.mxu1 %v1687_v0 }
 0x6a7   :  { %v471_v31 = vpop.f32.mrf.mxu1 }
 0x6a8   :  { %v477_v32 = vadd.f32 %v471_v31, %v435_v30 }
 0x6a9   :  { %v1443_v33 = vpop.f32.mrf.mxu1 }
 0x6aa   :  { %1669 = vtanh.f32 %v477_v32 }
 0x6ab   :  { %v474_v34 = vpop.f32.mrf.mxu1 }
 0x6ad   :  { %v1444_v35 = vpop.f32.mrf.mxu1 }
 0x6b7   :  { %v1670_v36 = vpop.eup %1669 }
 0x6b8   :  { %481 = vst [vmem:[%s2225_s7] sm:$0xff] %v1670_v36  ;;  %v510_v37 = vpack.c.bf16 %v1670_v36, %v1668_v25 }
 0x6ba   :  { %1466 = vmatmul.mubr.bf16.gmra.mxu0 %v510_v37 }
 0x6bb   :  { %1505 = vmatprep.mubr.msk.bf16.mxu0 %vm1688_vm0, %v1687_v0 }
 0x6c7   :  { %v740_v42 = vpop.f32.mrf.mxu1 }
 0x6c8   :  { %v746_v43 = vadd.f32 %v740_v42, %v600_v41 }
 0x6c9   :  { %v1487_v44 = vpop.f32.mrf.mxu1 }
 0x6ca   :  { %1671 = vtanh.f32 %v746_v43 }
 0x6cb   :  { %v743_v45 = vpop.f32.mrf.mxu1 }
 0x6cd   :  { %v1488_v46 = vpop.f32.mrf.mxu1 }
 0x6d7   :  { %v1672_v47 = vpop.eup %1671 }
 0x6d8   :  { %v748_v48 = vpack.c.bf16 %v1672_v47, %v1672_v47 }
 0x6da   :  { %749 = vst [vmem:[%s2227_s6] sm:$0xf] %v748_v48  ;;  %1506 = vmatmul.mubr.bf16.vlgmr.msra.gmra.mxu0 %v748_v48 }
 0x6db   :  { %1530 = vmatpush3.bf16.msra.mxu0 %v1974_v10  ;;  %1545 = vmatprep.mubr.msk.bf16.mxu0 %vm1688_vm0, %v1687_v0 }
 0x6dc   :  { %1531 = vmatprep.subr.bf16.mxu0 %v1687_v0 }
 0x6df   :  { %1532 = vmatpush3.bf16.msra.mxu0 %v1980_v11 }
 0x6e0   :  { %1533 = vmatprep.subr.bf16.mxu0 %v1687_v0 }
 0x6e3   :  { %1534 = vmatpush3.bf16.msra.mxu0 %v1988_v12 }
 0x6e4   :  { %1535 = vmatprep.subr.bf16.mxu0 %v1687_v0 }
 0x6e7   :  { %1536 = vmatpush3.bf16.msra.mxu0 %v1995_v13 }
 0x6e8   :  { %1537 = vmatprep.subr.bf16.mxu0 %v1687_v0 }
 0x6eb   :  { %1538 = vmatpush3.bf16.msra.mxu0 %v2002_v14 }
 0x6ec   :  { %1539 = vmatprep.subr.bf16.mxu0 %v1687_v0 }
 0x6ef   :  { %1540 = vmatpush3.bf16.msra.mxu0 %v2009_v15 }
 0x6f0   :  { %1541 = vmatprep.subr.bf16.mxu0 %v1687_v0 }
 0x6f3   :  { %1542 = vmatpush3.bf16.msra.mxu0 %v2016_v16 }
 0x6f4   :  { %1543 = vmatprep.subr.bf16.mxu0 %v1687_v0 }
 0x6f7   :  { %1544 = vmatpush3.bf16.msra.mxu0 %v2023_v17 }
 0x6f8   :  { %1569 = vmatprep.subr.bf16.mxu0 %v1687_v0 }
 0x77a   :  { %v2106_v51 = vpop.f32.mrf.mxu0 }
 0x77c   :  { %v2108_v52 = vpop.f32.mrf.mxu0 }
 0x77d   :  { %v616_v24 = vadd.f32 %v2082_v40, %v2108_v52 }
 0x77e   :  { %v2110_v53 = vpop.f32.mrf.mxu0 }
 0x77f   :  { %v627_v39 = vadd.f32 %v2110_v53, %v2082_v40 }
 0x780   :  { %v2112_v54 = vpop.f32.mrf.mxu0 }
 0x79a   :  { %v786_v56 = vpop.f32.mrf.mxu0 }
 0x79b   :  { %v792_v57 = vadd.f32 %v786_v56, %v603_v55 }
 0x79c   :  { %v1507_v58 = vpop.f32.mrf.mxu0 }
 0x79d   :  { %1673 = vtanh.f32 %v792_v57 }
 0x79e   :  { %v789_v59 = vpop.f32.mrf.mxu0 }
 0x7a0   :  { %v1508_v60 = vpop.f32.mrf.mxu0 }
 0x7aa   :  { %v1674_v61 = vpop.eup %1673 }
 0x7ab   :  { %v794_v62 = vpack.c.bf16 %v1674_v61, %v1674_v61 }
 0x7ad   :  { %1121 = vst [vmem:[%s2227_s6 + $0x4] sm:$0xf] %v794_v62  ;;  %1526 = vmatmul.mubr.bf16.vlgmr.msra.gmra.mxu1 %v794_v62 }
 0x7ae   :  { %1550 = vmatpush3.bf16.msra.mxu1 %v1974_v10  ;;  %1565 = vmatprep.mubr.msk.bf16.mxu1 %vm1688_vm0, %v1687_v0 }
 0x7af   :  { %1551 = vmatprep.subr.bf16.mxu1 %v1687_v0 }
 0x7b2   :  { %1552 = vmatpush3.bf16.msra.mxu1 %v1980_v11 }
 0x7b3   :  { %1553 = vmatprep.subr.bf16.mxu1 %v1687_v0 }
 0x7b6   :  { %1554 = vmatpush3.bf16.msra.mxu1 %v1988_v12 }
 0x7b7   :  { %1555 = vmatprep.subr.bf16.mxu1 %v1687_v0 }
 0x7ba   :  { %1556 = vmatpush3.bf16.msra.mxu1 %v1995_v13 }
 0x7bb   :  { %1557 = vmatprep.subr.bf16.mxu1 %v1687_v0 }
 0x7be   :  { %1558 = vmatpush3.bf16.msra.mxu1 %v2002_v14 }
 0x7bf   :  { %1559 = vmatprep.subr.bf16.mxu1 %v1687_v0 }
 0x7c2   :  { %1560 = vmatpush3.bf16.msra.mxu1 %v2009_v15 }
 0x7c3   :  { %1561 = vmatprep.subr.bf16.mxu1 %v1687_v0 }
 0x7c6   :  { %1562 = vmatpush3.bf16.msra.mxu1 %v2016_v16 }
 0x7c7   :  { %1563 = vmatprep.subr.bf16.mxu1 %v1687_v0 }
 0x7ca   :  { %1564 = vmatpush3.bf16.msra.mxu1 %v2023_v17 }
 0x7cb   :  { %1589 = vmatprep.subr.bf16.mxu1 %v1687_v0 }
 0x86d   :  { %v833_v1 = vpop.f32.mrf.mxu1 }
 0x86e   :  { %v839_v2 = vadd.f32 %v833_v1, %v608_v63 }
 0x86f   :  { %v1527_v3 = vpop.f32.mrf.mxu1 }
 0x870   :  { %1675 = vtanh.f32 %v839_v2 }
 0x871   :  { %v836_v4 = vpop.f32.mrf.mxu1 }
 0x873   :  { %v1528_v5 = vpop.f32.mrf.mxu1 }
 0x87d   :  { %v1676_v6 = vpop.eup %1675 }
 0x87e   :  { %v841_v7 = vpack.c.bf16 %v1676_v6, %v1676_v6 }
 0x880   :  { %1122 = vst [vmem:[%s2227_s6 + $0x8] sm:$0xf] %v841_v7  ;;  %1546 = vmatmul.mubr.bf16.vlgmr.msra.gmra.mxu0 %v841_v7 }
 0x881   :  { %1570 = vmatpush3.bf16.msra.mxu0 %v1974_v10  ;;  %1585 = vmatprep.mubr.msk.bf16.mxu0 %vm1688_vm0, %v1687_v0 }
 0x882   :  { %1571 = vmatprep.subr.bf16.mxu0 %v1687_v0 }
 0x885   :  { %1572 = vmatpush3.bf16.msra.mxu0 %v1980_v11 }
 0x886   :  { %1573 = vmatprep.subr.bf16.mxu0 %v1687_v0 }
 0x889   :  { %1574 = vmatpush3.bf16.msra.mxu0 %v1988_v12 }
 0x88a   :  { %1575 = vmatprep.subr.bf16.mxu0 %v1687_v0 }
 0x88d   :  { %1576 = vmatpush3.bf16.msra.mxu0 %v1995_v13 }
 0x88e   :  { %1577 = vmatprep.subr.bf16.mxu0 %v1687_v0 }
 0x891   :  { %1578 = vmatpush3.bf16.msra.mxu0 %v2002_v14 }
 0x892   :  { %1579 = vmatprep.subr.bf16.mxu0 %v1687_v0 }
 0x895   :  { %1580 = vmatpush3.bf16.msra.mxu0 %v2009_v15 }
 0x896   :  { %1581 = vmatprep.subr.bf16.mxu0 %v1687_v0 }
 0x899   :  { %1582 = vmatpush3.bf16.msra.mxu0 %v2016_v16 }
 0x89a   :  { %1583 = vmatprep.subr.bf16.mxu0 %v1687_v0 }
 0x89d   :  { %1584 = vmatpush3.bf16.msra.mxu0 %v2023_v17 }
 0x89e   :  { %1609 = vmatprep.subr.bf16.mxu0 %v1687_v0 }
 0x940   :  { %v880_v9 = vpop.f32.mrf.mxu0 }
 0x941   :  { %v886_v18 = vadd.f32 %v880_v9, %v611_v8 }
 0x942   :  { %v1547_v19 = vpop.f32.mrf.mxu0 }
 0x943   :  { %1677 = vtanh.f32 %v886_v18 }
 0x944   :  { %v883_v20 = vpop.f32.mrf.mxu0 }
 0x946   :  { %v1548_v21 = vpop.f32.mrf.mxu0 }
 0x950   :  { %v1678_v22 = vpop.eup %1677 }
 0x951   :  { %v888_v23 = vpack.c.bf16 %v1678_v22, %v1678_v22 }
 0x953   :  { %1123 = vst [vmem:[%s2227_s6 + $0xc] sm:$0xf] %v888_v23  ;;  %1566 = vmatmul.mubr.bf16.vlgmr.msra.gmra.mxu1 %v888_v23 }
 0x954   :  { %1590 = vmatpush3.bf16.msra.mxu1 %v1974_v10  ;;  %1605 = vmatprep.mubr.msk.bf16.mxu1 %vm1688_vm0, %v1687_v0 }
 0x955   :  { %1591 = vmatprep.subr.bf16.mxu1 %v1687_v0 }
 0x958   :  { %1592 = vmatpush3.bf16.msra.mxu1 %v1980_v11 }
 0x959   :  { %1593 = vmatprep.subr.bf16.mxu1 %v1687_v0 }
 0x95c   :  { %1594 = vmatpush3.bf16.msra.mxu1 %v1988_v12 }
 0x95d   :  { %1595 = vmatprep.subr.bf16.mxu1 %v1687_v0 }
 0x960   :  { %1596 = vmatpush3.bf16.msra.mxu1 %v1995_v13 }
 0x961   :  { %1597 = vmatprep.subr.bf16.mxu1 %v1687_v0 }
 0x964   :  { %1598 = vmatpush3.bf16.msra.mxu1 %v2002_v14 }
 0x965   :  { %1599 = vmatprep.subr.bf16.mxu1 %v1687_v0 }
 0x968   :  { %1600 = vmatpush3.bf16.msra.mxu1 %v2009_v15 }
 0x969   :  { %1601 = vmatprep.subr.bf16.mxu1 %v1687_v0 }
 0x96c   :  { %1602 = vmatpush3.bf16.msra.mxu1 %v2016_v16 }
 0x96d   :  { %1603 = vmatprep.subr.bf16.mxu1 %v1687_v0 }
 0x970   :  { %1604 = vmatpush3.bf16.msra.mxu1 %v2023_v17 }
 0xa13   :  { %v927_v25 = vpop.f32.mrf.mxu1 }
 0xa14   :  { %v933_v26 = vadd.f32 %v927_v25, %v616_v24 }
 0xa15   :  { %v1567_v27 = vpop.f32.mrf.mxu1 }
 0xa16   :  { %1679 = vtanh.f32 %v933_v26 }
 0xa17   :  { %v930_v28 = vpop.f32.mrf.mxu1 }
 0xa19   :  { %v1568_v29 = vpop.f32.mrf.mxu1 }
 0xa23   :  { %v1680_v30 = vpop.eup %1679 }
 0xa24   :  { %v935_v31 = vpack.c.bf16 %v1680_v30, %v1680_v30 }
 0xa26   :  { %1124 = vst [vmem:[%s2227_s6 + $0x10] sm:$0xf] %v935_v31  ;;  %1586 = vmatmul.mubr.bf16.vlgmr.msra.gmra.mxu0 %v935_v31 }
 0xa27   :  { %1610 = vmatpush3.bf16.msra.mxu0 %v1974_v10  ;;  %1625 = vmatprep.mubr.msk.bf16.mxu0 %vm1688_vm0, %v1687_v0  ;;  %v619_v10 = vadd.f32 %v2082_v40, %v2112_v54 }
 0xa28   :  { %1611 = vmatprep.subr.bf16.mxu0 %v1687_v0 }
 0xa2b   :  { %1612 = vmatpush3.bf16.msra.mxu0 %v1980_v11 }
 0xa2c   :  { %1613 = vmatprep.subr.bf16.mxu0 %v1687_v0 }
 0xa2f   :  { %1614 = vmatpush3.bf16.msra.mxu0 %v1988_v12 }
 0xa30   :  { %1615 = vmatprep.subr.bf16.mxu0 %v1687_v0 }
 0xa33   :  { %1616 = vmatpush3.bf16.msra.mxu0 %v1995_v13 }
 0xa34   :  { %1617 = vmatprep.subr.bf16.mxu0 %v1687_v0 }
 0xa37   :  { %1618 = vmatpush3.bf16.msra.mxu0 %v2002_v14 }
 0xa38   :  { %1619 = vmatprep.subr.bf16.mxu0 %v1687_v0 }
 0xa3b   :  { %1620 = vmatpush3.bf16.msra.mxu0 %v2009_v15 }
 0xa3c   :  { %1621 = vmatprep.subr.bf16.mxu0 %v1687_v0 }
 0xa3f   :  { %1622 = vmatpush3.bf16.msra.mxu0 %v2016_v16 }
 0xa40   :  { %1623 = vmatprep.subr.bf16.mxu0 %v1687_v0  ;;  %v624_v0 = vadd.f32 %v2106_v51, %v2082_v40 }
 0xa43   :  { %1624 = vmatpush3.bf16.msra.mxu0 %v2023_v17 }
 0xae6   :  { %v974_v11 = vpop.f32.mrf.mxu0 }
 0xae7   :  { %v980_v12 = vadd.f32 %v974_v11, %v619_v10 }
 0xae8   :  { %v1587_v13 = vpop.f32.mrf.mxu0 }
 0xae9   :  { %1681 = vtanh.f32 %v980_v12 }
 0xaea   :  { %v977_v14 = vpop.f32.mrf.mxu0 }
 0xaec   :  { %v1588_v32 = vpop.f32.mrf.mxu0 }
 0xaf6   :  { %v1682_v33 = vpop.eup %1681 }
 0xaf7   :  { %v982_v34 = vpack.c.bf16 %v1682_v33, %v1682_v33 }
 0xaf9   :  { %1125 = vst [vmem:[%s2227_s6 + $0x14] sm:$0xf] %v982_v34  ;;  %1606 = vmatmul.mubr.bf16.vlgmr.msra.gmra.mxu1 %v982_v34 }
 0xbb9   :  { %v1021_v15 = vpop.f32.mrf.mxu1 }
 0xbba   :  { %v1027_v16 = vadd.f32 %v1021_v15, %v624_v0 }
 0xbbb   :  { %v1607_v17 = vpop.f32.mrf.mxu1 }
 0xbbc   :  { %1683 = vtanh.f32 %v1027_v16 }
 0xbbd   :  { %v1024_v35 = vpop.f32.mrf.mxu1 }
 0xbbf   :  { %v1608_v36 = vpop.f32.mrf.mxu1 }
 0xbc9   :  { %v1684_v37 = vpop.eup %1683 }
 0xbca   :  { %v1029_v38 = vpack.c.bf16 %v1684_v37, %v1684_v37 }
 0xbcc   :  { %1126 = vst [vmem:[%s2227_s6 + $0x18] sm:$0xf] %v1029_v38  ;;  %1626 = vmatmul.mubr.bf16.vlgmr.msra.gmra.mxu0 %v1029_v38 }
 0xc8c   :  { %v1068_v41 = vpop.f32.mrf.mxu0 }
 0xc8d   :  { %v1074_v42 = vadd.f32 %v1068_v41, %v627_v39 }
 0xc8e   :  { %v1627_v43 = vpop.f32.mrf.mxu0 }
 0xc8f   :  { %1685 = vtanh.f32 %v1074_v42 }
 0xc90   :  { %v1071_v44 = vpop.f32.mrf.mxu0 }
 0xc92   :  { %v1628_v45 = vpop.f32.mrf.mxu0 }
 0xc9c   :  { %v1686_v46 = vpop.eup %1685 }
 0xc9d   :  { %v1076_v47 = vpack.c.bf16 %v1686_v46, %v1686_v46  ;;  %1128 = vst [vmem:[%s2225_s7 + $0x8] sm:$0xff] %v1686_v46 }
 0xc9f   :  { %1127 = vst [vmem:[%s2227_s6 + $0x1c] sm:$0xf] %v1076_v47 }

</bundles_post_ra>
